<compile_context>
chip_gen: v6e
topology: v6e:2x2x1
jax: 0.10.0
libtpu: 0.0.40
codegen_flags: <defaults>
</compile_context>

<pallas_src>
import functools

import jax
import jax.numpy as jnp
import numpy as np
from jax.experimental import pallas as pl
from jax.experimental.pallas import tpu as pltpu

ARCHITECTURE = (500, 400, 200)
LN_EPS = 1e-5


def _relu_layernorm(z, g, be, n):
    """ReLU then LayerNorm (biased variance, eps=1e-5); one-pass statistics."""
    z = jnp.maximum(z, 0.0)
    inv_n = 1.0 / n                                   # static Python constant
    s = jnp.sum(z, axis=-1, keepdims=True)            # XLU reduce
    sq = jnp.sum(z * z, axis=-1, keepdims=True)       # XLU reduce
    mu = s * inv_n
    var = sq * inv_n - mu * mu
    return (z - mu) * jax.lax.rsqrt(var + LN_EPS) * g + be


def _critic_kernel(s_ref, a_ref,
                   w1s_ref, w1a_ref, b1_ref, g1_ref, be1_ref,
                   w2_ref, b2_ref, g2_ref, be2_ref,
                   w3_ref, b3_ref, g3_ref, be3_ref,
                   w4_ref, b4_ref,
                   out_ref):
    """Full Q-network forward for one head (grid axis 0) / one batch tile."""
    s = s_ref[...].astype(jnp.float32)
    a = a_ref[...].astype(jnp.float32)

    # Fused concat: cat([s, a], 1) @ W1 == s @ W1[:sd] + a @ W1[sd:]
    z = (jnp.dot(s, w1s_ref[...], preferred_element_type=jnp.float32)
         + jnp.dot(a, w1a_ref[...], preferred_element_type=jnp.float32)
         + b1_ref[...])
    z = _relu_layernorm(z, g1_ref[...], be1_ref[...], ARCHITECTURE[0])

    z = jnp.dot(z, w2_ref[...], preferred_element_type=jnp.float32) + b2_ref[...]
    z = _relu_layernorm(z, g2_ref[...], be2_ref[...], ARCHITECTURE[1])

    z = jnp.dot(z, w3_ref[...], preferred_element_type=jnp.float32) + b3_ref[...]
    z = _relu_layernorm(z, g3_ref[...], be3_ref[...], ARCHITECTURE[2])

    out_ref[...] = (jnp.dot(z, w4_ref[...], preferred_element_type=jnp.float32)
                    + b4_ref[...]).astype(out_ref.dtype)


@functools.partial(jax.jit)
def critic_forward(state, action, q1_params, q2_params):
    """Critic.forward: returns (Q1(state, action), Q2(state, action)).

    q{1,2}_params: flat lists [w1,b1,g1,be1, w2,b2,g2,be2, w3,b3,g3,be3, w4,b4]
    with weights shaped (in, out) and biases / LN params shaped (1, out).
    """
    state = state.astype(jnp.float32)
    action = action.astype(jnp.float32)
    B, sd = state.shape
    ad = action.shape[1]

    # Stack the two heads along a leading axis -> one fused kernel; on v7x the
    # head grid axis (parallel) shards across the two TensorCores.
    stacked = [jnp.stack([p1, p2], axis=0)
               for p1, p2 in zip(q1_params, q2_params)]
    w1 = stacked[0]                                    # (2, sd+ad, 500)
    params = [w1[:, :sd, :], w1[:, sd:, :]] + stacked[1:]

    # Batch tiling: a no-op at small B, pipelines DMA/compute at training B.
    bt = B if B <= 256 else 256
    nbt = pl.cdiv(B, bt)

    def head_map(h, i):           # params depend only on the head index, so
        return (h, 0, 0)          # they stay resident across batch tiles.

    param_specs = [pl.BlockSpec((None,) + tuple(p.shape[1:]), head_map)
                   for p in params]

    out = pl.pallas_call(
        _critic_kernel,
        out_shape=jax.ShapeDtypeStruct((2, B, 1), jnp.float32),
        grid=(2, nbt),
        in_specs=[pl.BlockSpec((bt, sd), lambda h, i: (i, 0)),
                  pl.BlockSpec((bt, ad), lambda h, i: (i, 0))] + param_specs,
        out_specs=pl.BlockSpec((None, bt, 1), lambda h, i: (h, i, 0)),
        compiler_params=pltpu.CompilerParams(
            dimension_semantics=("parallel", "parallel"),
            vmem_limit_bytes=8 << 20),
    )(state, action, *params)

    return out[0], out[1]


def init_q_params(key, state_dim, action_dim):
    """Deterministic init matching Q.__init__ shapes (norm='layer')."""
    dims_in = [state_dim + action_dim] + list(ARCHITECTURE)
    dims_out = list(ARCHITECTURE) + [1]
    params = []
    for i, (din, dout) in enumerate(zip(dims_in, dims_out)):
        key, kw, kb = jax.random.split(key, 3)
        bound = 1.0 / np.sqrt(din)   # PyTorch nn.Linear default init range
        w = jax.random.uniform(kw, (din, dout), jnp.float32, -bound, bound)
        b = jax.random.uniform(kb, (1, dout), jnp.float32, -bound, bound)
        params += [w, b]
        if i < len(ARCHITECTURE):    # hidden layer -> LayerNorm(gamma, beta)
            params += [jnp.ones((1, dout), jnp.float32),
                       jnp.zeros((1, dout), jnp.float32)]
    return params
# TODO(synk): norm='weight_normalization' variant not implemented (only 'layer').


def _q_reference(x, params):
    """Pure-JAX reference (standard two-pass LayerNorm) for correctness."""
    h = x
    idx = 0
    for _ in ARCHITECTURE:
        w, b, g, be = params[idx:idx + 4]
        idx += 4
        h = jnp.maximum(h @ w + b, 0.0)
        mu = jnp.mean(h, axis=-1, keepdims=True)
        var = jnp.mean((h - mu) ** 2, axis=-1, keepdims=True)
        h = (h - mu) / jnp.sqrt(var + LN_EPS) * g + be
    w, b = params[idx:idx + 2]
    return h @ w + b


if __name__ == "__main__":
    state_dim, action_dim, batch = 12, 4, 8

    root = jax.random.PRNGKey(0)
    k_state, k_action, k_q1, k_q2 = jax.random.split(root, 4)

    state = jax.random.normal(k_state, (batch, state_dim), jnp.float32)
    action = jax.random.normal(k_action, (batch, action_dim), jnp.float32)

    q1_params = init_q_params(k_q1, state_dim, action_dim)
    q2_params = init_q_params(k_q2, state_dim, action_dim)

    q1_out, q2_out = critic_forward(state, action, q1_params, q2_params)
    q1_out = jax.block_until_ready(q1_out)
    q2_out = jax.block_until_ready(q2_out)

    # Verify against a plain-JAX reference of the same math.
    x = jnp.concatenate([state, action], axis=1)
    ref1 = _q_reference(x, q1_params)
    ref2 = _q_reference(x, q2_params)
    np.testing.assert_allclose(np.asarray(q1_out), np.asarray(ref1),
                               rtol=1e-4, atol=1e-4)
    np.testing.assert_allclose(np.asarray(q2_out), np.asarray(ref2),
                               rtol=1e-4, atol=1e-4)
    assert q1_out.shape == (batch, 1) and q2_out.shape == (batch, 1)

    print("KERNEL_OK")
</pallas_src>

<mosaic_0001>
module attributes {stable_mosaic.version = 11 : i64} {
  func.func @_critic_kernel(%arg0: i32, %arg1: i32, %arg2: memref<8x12xf32, #tpu.memory_space<vmem>>, %arg3: memref<8x4xf32, #tpu.memory_space<vmem>>, %arg4: memref<1x12x500xf32, #tpu.memory_space<vmem>>, %arg5: memref<1x4x500xf32, #tpu.memory_space<vmem>>, %arg6: memref<1x1x500xf32, #tpu.memory_space<vmem>>, %arg7: memref<1x1x500xf32, #tpu.memory_space<vmem>>, %arg8: memref<1x1x500xf32, #tpu.memory_space<vmem>>, %arg9: memref<1x500x400xf32, #tpu.memory_space<vmem>>, %arg10: memref<1x1x400xf32, #tpu.memory_space<vmem>>, %arg11: memref<1x1x400xf32, #tpu.memory_space<vmem>>, %arg12: memref<1x1x400xf32, #tpu.memory_space<vmem>>, %arg13: memref<1x400x200xf32, #tpu.memory_space<vmem>>, %arg14: memref<1x1x200xf32, #tpu.memory_space<vmem>>, %arg15: memref<1x1x200xf32, #tpu.memory_space<vmem>>, %arg16: memref<1x1x200xf32, #tpu.memory_space<vmem>>, %arg17: memref<1x200x1xf32, #tpu.memory_space<vmem>>, %arg18: memref<1x1x1xf32, #tpu.memory_space<vmem>>, %arg19: memref<1x8x1xf32, #tpu.memory_space<vmem>>) attributes {dimension_semantics = [#tpu.dimension_semantics<parallel>, #tpu.dimension_semantics<parallel>], iteration_bounds = array<i64: 2, 1>, scalar_prefetch = 0 : i64, scratch_operands = 0 : i64, tpu.core_type = #tpu.core_type<tc>, window_params = [{transform_indices = @transform_0, window_bounds = array<i64: 8, 12>}, {transform_indices = @transform_1, window_bounds = array<i64: 8, 4>}, {transform_indices = @transform_2, window_bounds = array<i64: 1, 12, 500>}, {transform_indices = @transform_3, window_bounds = array<i64: 1, 4, 500>}, {transform_indices = @transform_4, window_bounds = array<i64: 1, 1, 500>}, {transform_indices = @transform_5, window_bounds = array<i64: 1, 1, 500>}, {transform_indices = @transform_6, window_bounds = array<i64: 1, 1, 500>}, {transform_indices = @transform_7, window_bounds = array<i64: 1, 500, 400>}, {transform_indices = @transform_8, window_bounds = array<i64: 1, 1, 400>}, {transform_indices = @transform_9, window_bounds = array<i64: 1, 1, 400>}, {transform_indices = @transform_10, window_bounds = array<i64: 1, 1, 400>}, {transform_indices = @transform_11, window_bounds = array<i64: 1, 400, 200>}, {transform_indices = @transform_12, window_bounds = array<i64: 1, 1, 200>}, {transform_indices = @transform_13, window_bounds = array<i64: 1, 1, 200>}, {transform_indices = @transform_14, window_bounds = array<i64: 1, 1, 200>}, {transform_indices = @transform_15, window_bounds = array<i64: 1, 200, 1>}, {transform_indices = @transform_16, window_bounds = array<i64: 1, 1, 1>}, {transform_indices = @transform_17, window_bounds = array<i64: 1, 8, 1>}]} {
    %c0 = arith.constant 0 : index
    %c0_0 = arith.constant 0 : index
    %0 = vector.load %arg2[%c0, %c0_0] : memref<8x12xf32, #tpu.memory_space<vmem>>, vector<8x12xf32>
    %c0_1 = arith.constant 0 : index
    %c0_2 = arith.constant 0 : index
    %1 = vector.load %arg3[%c0_1, %c0_2] : memref<8x4xf32, #tpu.memory_space<vmem>>, vector<8x4xf32>
    %c0_3 = arith.constant 0 : index
    %c0_4 = arith.constant 0 : index
    %c0_5 = arith.constant 0 : index
    %2 = vector.load %arg4[%c0_3, %c0_4, %c0_5] : memref<1x12x500xf32, #tpu.memory_space<vmem>>, vector<1x12x500xf32>
    %3 = vector.shape_cast %2 : vector<1x12x500xf32> to vector<12x500xf32>
    %cst = arith.constant dense<0.000000e+00> : vector<8x500xf32>
    %4 = tpu.matmul %0, %3, %cst {dimension_numbers = #tpu.dot_dimension_numbers<[1], [0], [0], [1], [0, 0, 1, 1], [], []>} : vector<8x12xf32>, vector<12x500xf32>, vector<8x500xf32> -> vector<8x500xf32>
    %c0_6 = arith.constant 0 : index
    %c0_7 = arith.constant 0 : index
    %c0_8 = arith.constant 0 : index
    %5 = vector.load %arg5[%c0_6, %c0_7, %c0_8] : memref<1x4x500xf32, #tpu.memory_space<vmem>>, vector<1x4x500xf32>
    %6 = vector.shape_cast %5 : vector<1x4x500xf32> to vector<4x500xf32>
    %cst_9 = arith.constant dense<0.000000e+00> : vector<8x500xf32>
    %7 = tpu.matmul %1, %6, %cst_9 {dimension_numbers = #tpu.dot_dimension_numbers<[1], [0], [0], [1], [0, 0, 1, 1], [], []>} : vector<8x4xf32>, vector<4x500xf32>, vector<8x500xf32> -> vector<8x500xf32>
    %8 = arith.addf %4, %7 : vector<8x500xf32>
    %c0_10 = arith.constant 0 : index
    %c0_11 = arith.constant 0 : index
    %c0_12 = arith.constant 0 : index
    %9 = vector.load %arg6[%c0_10, %c0_11, %c0_12] : memref<1x1x500xf32, #tpu.memory_space<vmem>>, vector<1x1x500xf32>
    %10 = vector.shape_cast %9 : vector<1x1x500xf32> to vector<1x500xf32>
    %11 = vector.broadcast %10 : vector<1x500xf32> to vector<8x500xf32>
    %12 = arith.addf %8, %11 : vector<8x500xf32>
    %c0_13 = arith.constant 0 : index
    %c0_14 = arith.constant 0 : index
    %c0_15 = arith.constant 0 : index
    %13 = vector.load %arg7[%c0_13, %c0_14, %c0_15] : memref<1x1x500xf32, #tpu.memory_space<vmem>>, vector<1x1x500xf32>
    %14 = vector.shape_cast %13 : vector<1x1x500xf32> to vector<1x500xf32>
    %c0_16 = arith.constant 0 : index
    %c0_17 = arith.constant 0 : index
    %c0_18 = arith.constant 0 : index
    %15 = vector.load %arg8[%c0_16, %c0_17, %c0_18] : memref<1x1x500xf32, #tpu.memory_space<vmem>>, vector<1x1x500xf32>
    %16 = vector.shape_cast %15 : vector<1x1x500xf32> to vector<1x500xf32>
    %cst_19 = arith.constant 0.000000e+00 : f32
    %17 = vector.broadcast %cst_19 : f32 to vector<8x500xf32>
    %18 = arith.maximumf %12, %17 : vector<8x500xf32>
    %cst_20 = arith.constant dense<0.000000e+00> : vector<8xf32>
    %19 = vector.multi_reduction <add>, %18, %cst_20 [1] : vector<8x500xf32> to vector<8xf32>
    %20 = vector.shape_cast %19 : vector<8xf32> to vector<8x1xf32>
    %21 = arith.mulf %18, %18 : vector<8x500xf32>
    %cst_21 = arith.constant dense<0.000000e+00> : vector<8xf32>
    %22 = vector.multi_reduction <add>, %21, %cst_21 [1] : vector<8x500xf32> to vector<8xf32>
    %23 = vector.shape_cast %22 : vector<8xf32> to vector<8x1xf32>
    %cst_22 = arith.constant 2.000000e-03 : f32
    %24 = vector.broadcast %cst_22 : f32 to vector<8x1xf32>
    %25 = arith.mulf %20, %24 : vector<8x1xf32>
    %cst_23 = arith.constant 2.000000e-03 : f32
    %26 = vector.broadcast %cst_23 : f32 to vector<8x1xf32>
    %27 = arith.mulf %23, %26 : vector<8x1xf32>
    %28 = arith.mulf %25, %25 : vector<8x1xf32>
    %29 = arith.subf %27, %28 : vector<8x1xf32>
    %30 = vector.broadcast %25 : vector<8x1xf32> to vector<8x500xf32>
    %31 = arith.subf %18, %30 : vector<8x500xf32>
    %cst_24 = arith.constant 9.99999974E-6 : f32
    %32 = vector.broadcast %cst_24 : f32 to vector<8x1xf32>
    %33 = arith.addf %29, %32 : vector<8x1xf32>
    %34 = math.rsqrt %33 : vector<8x1xf32>
    %35 = vector.broadcast %34 : vector<8x1xf32> to vector<8x500xf32>
    %36 = arith.mulf %31, %35 : vector<8x500xf32>
    %37 = vector.broadcast %14 : vector<1x500xf32> to vector<8x500xf32>
    %38 = arith.mulf %36, %37 : vector<8x500xf32>
    %39 = vector.broadcast %16 : vector<1x500xf32> to vector<8x500xf32>
    %40 = arith.addf %38, %39 : vector<8x500xf32>
    %c0_25 = arith.constant 0 : index
    %c0_26 = arith.constant 0 : index
    %c0_27 = arith.constant 0 : index
    %41 = vector.load %arg9[%c0_25, %c0_26, %c0_27] : memref<1x500x400xf32, #tpu.memory_space<vmem>>, vector<1x500x400xf32>
    %42 = vector.shape_cast %41 : vector<1x500x400xf32> to vector<500x400xf32>
    %cst_28 = arith.constant dense<0.000000e+00> : vector<8x400xf32>
    %43 = tpu.matmul %40, %42, %cst_28 {dimension_numbers = #tpu.dot_dimension_numbers<[1], [0], [0], [1], [0, 0, 1, 1], [], []>} : vector<8x500xf32>, vector<500x400xf32>, vector<8x400xf32> -> vector<8x400xf32>
    %c0_29 = arith.constant 0 : index
    %c0_30 = arith.constant 0 : index
    %c0_31 = arith.constant 0 : index
    %44 = vector.load %arg10[%c0_29, %c0_30, %c0_31] : memref<1x1x400xf32, #tpu.memory_space<vmem>>, vector<1x1x400xf32>
    %45 = vector.shape_cast %44 : vector<1x1x400xf32> to vector<1x400xf32>
    %46 = vector.broadcast %45 : vector<1x400xf32> to vector<8x400xf32>
    %47 = arith.addf %43, %46 : vector<8x400xf32>
    %c0_32 = arith.constant 0 : index
    %c0_33 = arith.constant 0 : index
    %c0_34 = arith.constant 0 : index
    %48 = vector.load %arg11[%c0_32, %c0_33, %c0_34] : memref<1x1x400xf32, #tpu.memory_space<vmem>>, vector<1x1x400xf32>
    %49 = vector.shape_cast %48 : vector<1x1x400xf32> to vector<1x400xf32>
    %c0_35 = arith.constant 0 : index
    %c0_36 = arith.constant 0 : index
    %c0_37 = arith.constant 0 : index
    %50 = vector.load %arg12[%c0_35, %c0_36, %c0_37] : memref<1x1x400xf32, #tpu.memory_space<vmem>>, vector<1x1x400xf32>
    %51 = vector.shape_cast %50 : vector<1x1x400xf32> to vector<1x400xf32>
    %cst_38 = arith.constant 0.000000e+00 : f32
    %52 = vector.broadcast %cst_38 : f32 to vector<8x400xf32>
    %53 = arith.maximumf %47, %52 : vector<8x400xf32>
    %cst_39 = arith.constant dense<0.000000e+00> : vector<8xf32>
    %54 = vector.multi_reduction <add>, %53, %cst_39 [1] : vector<8x400xf32> to vector<8xf32>
    %55 = vector.shape_cast %54 : vector<8xf32> to vector<8x1xf32>
    %56 = arith.mulf %53, %53 : vector<8x400xf32>
    %cst_40 = arith.constant dense<0.000000e+00> : vector<8xf32>
    %57 = vector.multi_reduction <add>, %56, %cst_40 [1] : vector<8x400xf32> to vector<8xf32>
    %58 = vector.shape_cast %57 : vector<8xf32> to vector<8x1xf32>
    %cst_41 = arith.constant 2.500000e-03 : f32
    %59 = vector.broadcast %cst_41 : f32 to vector<8x1xf32>
    %60 = arith.mulf %55, %59 : vector<8x1xf32>
    %cst_42 = arith.constant 2.500000e-03 : f32
    %61 = vector.broadcast %cst_42 : f32 to vector<8x1xf32>
    %62 = arith.mulf %58, %61 : vector<8x1xf32>
    %63 = arith.mulf %60, %60 : vector<8x1xf32>
    %64 = arith.subf %62, %63 : vector<8x1xf32>
    %65 = vector.broadcast %60 : vector<8x1xf32> to vector<8x400xf32>
    %66 = arith.subf %53, %65 : vector<8x400xf32>
    %cst_43 = arith.constant 9.99999974E-6 : f32
    %67 = vector.broadcast %cst_43 : f32 to vector<8x1xf32>
    %68 = arith.addf %64, %67 : vector<8x1xf32>
    %69 = math.rsqrt %68 : vector<8x1xf32>
    %70 = vector.broadcast %69 : vector<8x1xf32> to vector<8x400xf32>
    %71 = arith.mulf %66, %70 : vector<8x400xf32>
    %72 = vector.broadcast %49 : vector<1x400xf32> to vector<8x400xf32>
    %73 = arith.mulf %71, %72 : vector<8x400xf32>
    %74 = vector.broadcast %51 : vector<1x400xf32> to vector<8x400xf32>
    %75 = arith.addf %73, %74 : vector<8x400xf32>
    %c0_44 = arith.constant 0 : index
    %c0_45 = arith.constant 0 : index
    %c0_46 = arith.constant 0 : index
    %76 = vector.load %arg13[%c0_44, %c0_45, %c0_46] : memref<1x400x200xf32, #tpu.memory_space<vmem>>, vector<1x400x200xf32>
    %77 = vector.shape_cast %76 : vector<1x400x200xf32> to vector<400x200xf32>
    %cst_47 = arith.constant dense<0.000000e+00> : vector<8x200xf32>
    %78 = tpu.matmul %75, %77, %cst_47 {dimension_numbers = #tpu.dot_dimension_numbers<[1], [0], [0], [1], [0, 0, 1, 1], [], []>} : vector<8x400xf32>, vector<400x200xf32>, vector<8x200xf32> -> vector<8x200xf32>
    %c0_48 = arith.constant 0 : index
    %c0_49 = arith.constant 0 : index
    %c0_50 = arith.constant 0 : index
    %79 = vector.load %arg14[%c0_48, %c0_49, %c0_50] : memref<1x1x200xf32, #tpu.memory_space<vmem>>, vector<1x1x200xf32>
    %80 = vector.shape_cast %79 : vector<1x1x200xf32> to vector<1x200xf32>
    %81 = vector.broadcast %80 : vector<1x200xf32> to vector<8x200xf32>
    %82 = arith.addf %78, %81 : vector<8x200xf32>
    %c0_51 = arith.constant 0 : index
    %c0_52 = arith.constant 0 : index
    %c0_53 = arith.constant 0 : index
    %83 = vector.load %arg15[%c0_51, %c0_52, %c0_53] : memref<1x1x200xf32, #tpu.memory_space<vmem>>, vector<1x1x200xf32>
    %84 = vector.shape_cast %83 : vector<1x1x200xf32> to vector<1x200xf32>
    %c0_54 = arith.constant 0 : index
    %c0_55 = arith.constant 0 : index
    %c0_56 = arith.constant 0 : index
    %85 = vector.load %arg16[%c0_54, %c0_55, %c0_56] : memref<1x1x200xf32, #tpu.memory_space<vmem>>, vector<1x1x200xf32>
    %86 = vector.shape_cast %85 : vector<1x1x200xf32> to vector<1x200xf32>
    %cst_57 = arith.constant 0.000000e+00 : f32
    %87 = vector.broadcast %cst_57 : f32 to vector<8x200xf32>
    %88 = arith.maximumf %82, %87 : vector<8x200xf32>
    %cst_58 = arith.constant dense<0.000000e+00> : vector<8xf32>
    %89 = vector.multi_reduction <add>, %88, %cst_58 [1] : vector<8x200xf32> to vector<8xf32>
    %90 = vector.shape_cast %89 : vector<8xf32> to vector<8x1xf32>
    %91 = arith.mulf %88, %88 : vector<8x200xf32>
    %cst_59 = arith.constant dense<0.000000e+00> : vector<8xf32>
    %92 = vector.multi_reduction <add>, %91, %cst_59 [1] : vector<8x200xf32> to vector<8xf32>
    %93 = vector.shape_cast %92 : vector<8xf32> to vector<8x1xf32>
    %cst_60 = arith.constant 5.000000e-03 : f32
    %94 = vector.broadcast %cst_60 : f32 to vector<8x1xf32>
    %95 = arith.mulf %90, %94 : vector<8x1xf32>
    %cst_61 = arith.constant 5.000000e-03 : f32
    %96 = vector.broadcast %cst_61 : f32 to vector<8x1xf32>
    %97 = arith.mulf %93, %96 : vector<8x1xf32>
    %98 = arith.mulf %95, %95 : vector<8x1xf32>
    %99 = arith.subf %97, %98 : vector<8x1xf32>
    %100 = vector.broadcast %95 : vector<8x1xf32> to vector<8x200xf32>
    %101 = arith.subf %88, %100 : vector<8x200xf32>
    %cst_62 = arith.constant 9.99999974E-6 : f32
    %102 = vector.broadcast %cst_62 : f32 to vector<8x1xf32>
    %103 = arith.addf %99, %102 : vector<8x1xf32>
    %104 = math.rsqrt %103 : vector<8x1xf32>
    %105 = vector.broadcast %104 : vector<8x1xf32> to vector<8x200xf32>
    %106 = arith.mulf %101, %105 : vector<8x200xf32>
    %107 = vector.broadcast %84 : vector<1x200xf32> to vector<8x200xf32>
    %108 = arith.mulf %106, %107 : vector<8x200xf32>
    %109 = vector.broadcast %86 : vector<1x200xf32> to vector<8x200xf32>
    %110 = arith.addf %108, %109 : vector<8x200xf32>
    %c0_63 = arith.constant 0 : index
    %c0_64 = arith.constant 0 : index
    %c0_65 = arith.constant 0 : index
    %111 = vector.load %arg17[%c0_63, %c0_64, %c0_65] : memref<1x200x1xf32, #tpu.memory_space<vmem>>, vector<1x200x1xf32>
    %112 = vector.shape_cast %111 : vector<1x200x1xf32> to vector<200x1xf32>
    %cst_66 = arith.constant dense<0.000000e+00> : vector<8x1xf32>
    %113 = tpu.matmul %110, %112, %cst_66 {dimension_numbers = #tpu.dot_dimension_numbers<[1], [0], [0], [1], [0, 0, 1, 1], [], []>} : vector<8x200xf32>, vector<200x1xf32>, vector<8x1xf32> -> vector<8x1xf32>
    %c0_67 = arith.constant 0 : index
    %c0_68 = arith.constant 0 : index
    %c0_69 = arith.constant 0 : index
    %114 = vector.load %arg18[%c0_67, %c0_68, %c0_69] : memref<1x1x1xf32, #tpu.memory_space<vmem>>, vector<1x1x1xf32>
    %115 = vector.shape_cast %114 : vector<1x1x1xf32> to vector<1x1xf32>
    %116 = vector.broadcast %115 : vector<1x1xf32> to vector<8x1xf32>
    %117 = arith.addf %113, %116 : vector<8x1xf32>
    %c0_70 = arith.constant 0 : index
    %c0_71 = arith.constant 0 : index
    %c0_72 = arith.constant 0 : index
    %118 = vector.load %arg19[%c0_70, %c0_71, %c0_72] : memref<1x8x1xf32, #tpu.memory_space<vmem>>, vector<1x8x1xf32>
    %119 = vector.shape_cast %118 : vector<1x8x1xf32> to vector<8x1xf32>
    %120 = vector.shape_cast %117 : vector<8x1xf32> to vector<1x8x1xf32>
    tpu.vector_store %arg19[%c0_70, %c0_71, %c0_72], %120 {strides = array<i32>} : memref<1x8x1xf32, #tpu.memory_space<vmem>>, vector<1x8x1xf32>,
    return
  }
  func.func @transform_0(%arg0: i32, %arg1: i32) -> (i32, i32) {
    %c0_i32 = arith.constant 0 : i32
    %c0_i32_0 = arith.constant 0 : i32
    return %arg1, %c0_i32 : i32, i32
  }
  func.func @transform_1(%arg0: i32, %arg1: i32) -> (i32, i32) {
    %c0_i32 = arith.constant 0 : i32
    %c0_i32_0 = arith.constant 0 : i32
    return %arg1, %c0_i32 : i32, i32
  }
  func.func @transform_2(%arg0: i32, %arg1: i32) -> (i32, i32, i32) {
    %c0_i32 = arith.constant 0 : i32
    %c0_i32_0 = arith.constant 0 : i32
    %c0_i32_1 = arith.constant 0 : i32
    return %arg0, %c0_i32, %c0_i32_0 : i32, i32, i32
  }
  func.func @transform_3(%arg0: i32, %arg1: i32) -> (i32, i32, i32) {
    %c0_i32 = arith.constant 0 : i32
    %c0_i32_0 = arith.constant 0 : i32
    %c0_i32_1 = arith.constant 0 : i32
    return %arg0, %c0_i32, %c0_i32_0 : i32, i32, i32
  }
  func.func @transform_4(%arg0: i32, %arg1: i32) -> (i32, i32, i32) {
    %c0_i32 = arith.constant 0 : i32
    %c0_i32_0 = arith.constant 0 : i32
    %c0_i32_1 = arith.constant 0 : i32
    return %arg0, %c0_i32, %c0_i32_0 : i32, i32, i32
  }
  func.func @transform_5(%arg0: i32, %arg1: i32) -> (i32, i32, i32) {
    %c0_i32 = arith.constant 0 : i32
    %c0_i32_0 = arith.constant 0 : i32
    %c0_i32_1 = arith.constant 0 : i32
    return %arg0, %c0_i32, %c0_i32_0 : i32, i32, i32
  }
  func.func @transform_6(%arg0: i32, %arg1: i32) -> (i32, i32, i32) {
    %c0_i32 = arith.constant 0 : i32
    %c0_i32_0 = arith.constant 0 : i32
    %c0_i32_1 = arith.constant 0 : i32
    return %arg0, %c0_i32, %c0_i32_0 : i32, i32, i32
  }
  func.func @transform_7(%arg0: i32, %arg1: i32) -> (i32, i32, i32) {
    %c0_i32 = arith.constant 0 : i32
    %c0_i32_0 = arith.constant 0 : i32
    %c0_i32_1 = arith.constant 0 : i32
    return %arg0, %c0_i32, %c0_i32_0 : i32, i32, i32
  }
  func.func @transform_8(%arg0: i32, %arg1: i32) -> (i32, i32, i32) {
    %c0_i32 = arith.constant 0 : i32
    %c0_i32_0 = arith.constant 0 : i32
    %c0_i32_1 = arith.constant 0 : i32
    return %arg0, %c0_i32, %c0_i32_0 : i32, i32, i32
  }
  func.func @transform_9(%arg0: i32, %arg1: i32) -> (i32, i32, i32) {
    %c0_i32 = arith.constant 0 : i32
    %c0_i32_0 = arith.constant 0 : i32
    %c0_i32_1 = arith.constant 0 : i32
    return %arg0, %c0_i32, %c0_i32_0 : i32, i32, i32
  }
  func.func @transform_10(%arg0: i32, %arg1: i32) -> (i32, i32, i32) {
    %c0_i32 = arith.constant 0 : i32
    %c0_i32_0 = arith.constant 0 : i32
    %c0_i32_1 = arith.constant 0 : i32
    return %arg0, %c0_i32, %c0_i32_0 : i32, i32, i32
  }
  func.func @transform_11(%arg0: i32, %arg1: i32) -> (i32, i32, i32) {
    %c0_i32 = arith.constant 0 : i32
    %c0_i32_0 = arith.constant 0 : i32
    %c0_i32_1 = arith.constant 0 : i32
    return %arg0, %c0_i32, %c0_i32_0 : i32, i32, i32
  }
  func.func @transform_12(%arg0: i32, %arg1: i32) -> (i32, i32, i32) {
    %c0_i32 = arith.constant 0 : i32
    %c0_i32_0 = arith.constant 0 : i32
    %c0_i32_1 = arith.constant 0 : i32
    return %arg0, %c0_i32, %c0_i32_0 : i32, i32, i32
  }
  func.func @transform_13(%arg0: i32, %arg1: i32) -> (i32, i32, i32) {
    %c0_i32 = arith.constant 0 : i32
    %c0_i32_0 = arith.constant 0 : i32
    %c0_i32_1 = arith.constant 0 : i32
    return %arg0, %c0_i32, %c0_i32_0 : i32, i32, i32
  }
  func.func @transform_14(%arg0: i32, %arg1: i32) -> (i32, i32, i32) {
    %c0_i32 = arith.constant 0 : i32
    %c0_i32_0 = arith.constant 0 : i32
    %c0_i32_1 = arith.constant 0 : i32
    return %arg0, %c0_i32, %c0_i32_0 : i32, i32, i32
  }
  func.func @transform_15(%arg0: i32, %arg1: i32) -> (i32, i32, i32) {
    %c0_i32 = arith.constant 0 : i32
    %c0_i32_0 = arith.constant 0 : i32
    %c0_i32_1 = arith.constant 0 : i32
    return %arg0, %c0_i32, %c0_i32_0 : i32, i32, i32
  }
  func.func @transform_16(%arg0: i32, %arg1: i32) -> (i32, i32, i32) {
    %c0_i32 = arith.constant 0 : i32
    %c0_i32_0 = arith.constant 0 : i32
    %c0_i32_1 = arith.constant 0 : i32
    return %arg0, %c0_i32, %c0_i32_0 : i32, i32, i32
  }
  func.func @transform_17(%arg0: i32, %arg1: i32) -> (i32, i32, i32) {
    %c0_i32 = arith.constant 0 : i32
    %c0_i32_0 = arith.constant 0 : i32
    return %arg0, %arg1, %c0_i32 : i32, i32, i32
  }
}

</mosaic_0001>

<bundles_post_ra>
// kernel: critic_forward.1
= control target key start
LH: loop header
LB: loop body
LE: loop exit
PB: predicated region body
PF: predicated region fallthrough
CT: control target
= control target key end

     0   :  { %s2832_s24 = smov 0   ;;  %s2834_s25 = smov 0   ;;  %s3477_s0 = inlined_call_operand.vmem [shape: f32[8,12], index: 0, kind: input, shape index: {}]   ;;  %s3478_s1 = inlined_call_operand.vmem [shape: f32[8,4], index: 1, kind: input, shape index: {}]   ;;  %s3479_s2 = inlined_call_operand.vmem [shape: f32[2,12,500], index: 2, kind: input, shape index: {}]   ;;  %s3480_s3 = inlined_call_operand.vmem [shape: f32[2,4,500], index: 3, kind: input, shape index: {}]   ;;  %s3481_s4 = inlined_call_operand.vmem [shape: f32[2,1,500], index: 4, kind: input, shape index: {}]   ;;  %s3482_s5 = inlined_call_operand.vmem [shape: f32[2,1,500], index: 5, kind: input, shape index: {}]   ;;  %s3483_s6 = inlined_call_operand.vmem [shape: f32[2,1,500], index: 6, kind: input, shape index: {}]   ;;  %s3484_s7 = inlined_call_operand.vmem [shape: f32[2,500,400], index: 7, kind: input, shape index: {}]   ;;  %s3485_s8 = inlined_call_operand.vmem [shape: f32[2,1,400], index: 8, kind: input, shape index: {}]   ;;  %s3486_s9 = inlined_call_operand.vmem [shape: f32[2,1,400], index: 9, kind: input, shape index: {}]   ;;  %s3487_s10 = inlined_call_operand.vmem [shape: f32[2,1,400], index: 10, kind: input, shape index: {}]   ;;  %s3488_s11 = inlined_call_operand.vmem [shape: f32[2,400,200], index: 11, kind: input, shape index: {}]   ;;  %s3489_s12 = inlined_call_operand.vmem [shape: f32[2,1,200], index: 12, kind: input, shape index: {}]   ;;  %s3490_s13 = inlined_call_operand.vmem [shape: f32[2,1,200], index: 13, kind: input, shape index: {}]   ;;  %s3491_s14 = inlined_call_operand.vmem [shape: f32[2,1,200], index: 14, kind: input, shape index: {}]   ;;  %s3492_s15 = inlined_call_operand.vmem [shape: f32[2,200,1], index: 15, kind: input, shape index: {}]   ;;  %s3493_s16 = inlined_call_operand.vmem [shape: f32[2,1,1], index: 16, kind: input, shape index: {}]   ;;  %s3494_s17 = inlined_call_operand.vmem [shape: f32[2,8,1], index: 17, kind: output, shape index: {}]  }
   0x1   :  { %3495 = sst [smem:[#allocation2_spill]] %s3477_s0  ;;  %s2836_s26 = smov 0  }
   0x2   :  { %3496 = sst [smem:[#allocation3_spill]] %s3478_s1 }
   0x3 LB: > { %s39_s27 = sadd.s32 1, %s2735_s25  ;;  %p2638_p0 = scmp.ge.s32.totalorder %s2739_s26, 1  ;;  %s2739_s26 = sphi %s2836_s26, %s27_s26   ;;  %s2735_s25 = sphi %s2834_s25, %s3500_s25   ;;  %s2731_s24 = sphi %s2832_s24, %s3499_s24  }
   0x4   : > { %p41_p1 = scmp.ge.s32.totalorder %s39_s27, 2  ;;  %p648_p2 = scmp.lt.s32.totalorder %s2739_s26, 3 }
   0x6   : > { %s3502_s27 = smov (%p41_p1, %s39_s27), 0  ;;  %p649_p3 = pnand %p2638_p0, %p648_p2 }
   0x7   : > { %p777_p4 = scmp.lt.s32.totalorder (!%p649_p3), %s2731_s24, 1  ;;  %s3497_s20 = sld [smem:[#allocation3_spill]] (!%p649_p3) }
   0x8   : > { %652 = sbr.rel (%p649_p3) target bundleno = 1411 (0x583), region = 88  ;;  %s3498_s0 = sld [smem:[#allocation2_spill]] (!%p649_p3) }
   0xd   : > { %v2741_v0 = vmov 0.0   ;;  %s3504_s24 = smov (!%p777_p4, %s2731_s24), 1  ;;  %vm868_vm0 = vcmask 1043456   ;;  %v849_v5 = vld [vmem:[%s3497_s20] sm:$0xff]  ;;  %vm864_vm1 = vcmask 31744   ;;  %vm1019_vm2 = vcmask 97280  }
   0xe   : > { %941 = vmatprep.mubr.f32.mxu0 %v2741_v0  ;;  %s2680_s28 = sshll.u32 %s3504_s24, 4  ;;  %s2679_s18 = sshll.u32 %s3504_s24, 6  ;;  %v848_v10 = vld [vmem:[%s3498_s0] sm:$0xff]  ;;  %vm1211_vm3 = vcmask 949248   ;;  %vm1871_vm4 = vcmask 130048   ;;  %vm2211_vm5 = vcmask 588800  }
   0xf   : > { %s786_s30 = scalar_lea.vmem %s3480_s3, %s2680_s28  ;;  %s781_s23 = scalar_lea.vmem %s3479_s2, %s2679_s18  ;;  %vm2363_vm6 = vcmask 7168  }
  0x10   : > { %v858_v1 = vld [vmem:[%s786_s30] sm:$0xff]  ;;  %v859_v2 = vld [vmem:[%s786_s30 + $0x8] sm:$0xff]  ;;  %v857_v11 = vld [vmem:[%s781_s23 + $0x38] sm:$0xf]  ;;  %s2681_s30 = smul.u32 2016, %s3504_s24  ;;  %s2951_s20 = sshll.u32 %s3504_s24, 2 }
  0x11   : > { %v862_v3 = vcombine.high %v858_v1, %v858_v1  ;;  %v863_v4 = vcombine.high %v859_v2, %v859_v2  ;;  %v855_v6 = vld [vmem:[%s781_s23 + $0x28] sm:$0xf]  ;;  %v854_v7 = vld [vmem:[%s781_s23 + $0x20] sm:$0xf]  ;;  %v856_v12 = vld [vmem:[%s781_s23 + $0x30] sm:$0xf]  ;;  %s794_s0 = scalar_lea.vmem %s3482_s5, %s2951_s20  ;;  %s798_s19 = scalar_lea.vmem %s3483_s6, %s2951_s20 }
  0x12   : > { %v851_v8 = vld [vmem:[%s781_s23 + $0x8] sm:$0xff]  ;;  %v850_v9 = vld [vmem:[%s781_s23] sm:$0xff]  ;;  %v853_v13 = vld [vmem:[%s781_s23 + $0x18] sm:$0xff]  ;;  %s2882_s1 = scalar_lea.vmem %s3484_s7, %s2681_s30  ;;  %s2682_s21 = smul.u32 800, %s3504_s24 }
  0x13   : > { %2656 = vmatprep.subr.msk.mxu0 %vm868_vm0, %v862_v3  ;;  %v852_v14 = vld [vmem:[%s781_s23 + $0x10] sm:$0xff]  ;;  %v1351_v15 = vld [vmem:[%s2882_s1 + $0x1e8] sm:$0xff]  ;;  %v1350_v16 = vld [vmem:[%s2882_s1 + $0x1e0] sm:$0xff]  ;;  %s790_s23 = scalar_lea.vmem %s3481_s4, %s2951_s20  ;;  %s840_s30 = scalar_lea.vmem %s3493_s16, %s3504_s24 }
  0x14   : > { %2657 = vmatpush1.msk.msra.mxu0 %vm868_vm0, %v858_v1  ;;  %v1347_v17 = vld [vmem:[%s2882_s1 + $0x1c8] sm:$0xff]  ;;  %v1346_v19 = vld [vmem:[%s2882_s1 + $0x1c0] sm:$0xff]  ;;  %s3215_s28 = scalar_lea.vmem %s3488_s11, %s2682_s21  ;;  %s2655_s18 = sshll.u32 %s3504_s24, 3 }
  0x15   : > { %2658 = vmatmul.mubr.msk.f32.vlgmr.msra.gmra.mxu0 %vm864_vm1, %v849_v5  ;;  %2659 = vmatprep.subr.msk.mxu0 %vm868_vm0, %v863_v4  ;;  %v1479_v18 = vld [vmem:[%s2882_s1 + $0x5e8] sm:$0xff]  ;;  %v1478_v20 = vld [vmem:[%s2882_s1 + $0x5e0] sm:$0xff]  ;;  %s847_s22 = scalar_lea.vmem %s3494_s17, %s2655_s18 }
  0x16   : > { %2660 = vmatpush1.msk.msra.mxu0 %vm868_vm0, %v859_v2  ;;  %1012 = vmatprep.mubr.f32.mxu0 %v2741_v0  ;;  %v1343_v21 = vld [vmem:[%s2882_s1 + $0x1a8] sm:$0xff]  ;;  %v1342_v23 = vld [vmem:[%s2882_s1 + $0x1a0] sm:$0xff] }
  0x17   : > { %2662 = vmatprep.subr.msk.mxu0 %vm868_vm0, %v855_v6  ;;  %1650 = vmatprep.subr.mxu1 %v1479_v18  ;;  %v1475_v22 = vld [vmem:[%s2882_s1 + $0x5c8] sm:$0xff]  ;;  %v1474_v24 = vld [vmem:[%s2882_s1 + $0x5c0] sm:$0xff]  ;;  %v1179_v18 = vlaneseq }
  0x18   : > { %1651 = vmatpush1.msra.mxu1 %v1478_v20  ;;  %v1471_v25 = vld [vmem:[%s2882_s1 + $0x5a8] sm:$0xff]  ;;  %v1470_v27 = vld [vmem:[%s2882_s1 + $0x5a0] sm:$0xff] }
  0x19   : > { %2661 = vmatmul.mubr.msk.f32.vlgmr.msra.gmra.mxu0 %vm864_vm1, %v849_v5  ;;  %1652 = vmatprep.subr.mxu1 %v1475_v22  ;;  %v1339_v26 = vld [vmem:[%s2882_s1 + $0x188] sm:$0xff]  ;;  %v1338_v28 = vld [vmem:[%s2882_s1 + $0x180] sm:$0xff] }
  0x1a   : > { %2663 = vmatpush1.msk.msra.mxu0 %vm868_vm0, %v854_v7  ;;  %1099 = vmatprep.mubr.f32.mxu0 %v2741_v0  ;;  %v1467_v29 = vld [vmem:[%s2882_s1 + $0x588] sm:$0xff]  ;;  %v1466_v31 = vld [vmem:[%s2882_s1 + $0x580] sm:$0xff] }
  0x1b   : > { %1065 = vmatprep.subr.mxu0 %v851_v8  ;;  %1653 = vmatpush1.msra.mxu1 %v1474_v24  ;;  %v1335_v30 = vld [vmem:[%s2882_s1 + $0x168] sm:$0xff]  ;;  %v1334_v32 = vld [vmem:[%s2882_s1 + $0x160] sm:$0xff] }
  0x1c   : > { %1066 = vmatpush1.msra.mxu0 %v850_v9  ;;  %1654 = vmatprep.subr.mxu1 %v1471_v25  ;;  %v1463_v33 = vld [vmem:[%s2882_s1 + $0x568] sm:$0xff]  ;;  %v1462_v35 = vld [vmem:[%s2882_s1 + $0x560] sm:$0xff] }
  0x1d   : > { %2664 = vmatmul.mubr.msk.f32.vlgmr.msra.gmra.mxu0 %vm1019_vm2, %v848_v10  ;;  %2665 = vmatprep.subr.msk.mxu0 %vm868_vm0, %v857_v11  ;;  %v1331_v34 = vld [vmem:[%s2882_s1 + $0x148] sm:$0xff]  ;;  %v1330_v36 = vld [vmem:[%s2882_s1 + $0x140] sm:$0xff] }
  0x1e   : > { %2666 = vmatpush1.msk.msra.mxu0 %vm868_vm0, %v856_v12  ;;  %1170 = vmatprep.mubr.f32.mxu0 %v2741_v0  ;;  %v1459_v37 = vld [vmem:[%s2882_s1 + $0x548] sm:$0xff]  ;;  %v1458_v39 = vld [vmem:[%s2882_s1 + $0x540] sm:$0xff] }
  0x1f   : > { %1136 = vmatprep.subr.mxu0 %v853_v13  ;;  %1655 = vmatpush1.msra.mxu1 %v1470_v27  ;;  %v1327_v38 = vld [vmem:[%s2882_s1 + $0x128] sm:$0xff]  ;;  %v1326_v40 = vld [vmem:[%s2882_s1 + $0x120] sm:$0xff] }
  0x20   : > { %1137 = vmatpush1.msra.mxu0 %v852_v14  ;;  %1656 = vmatprep.subr.mxu1 %v1467_v29  ;;  %v1455_v41 = vld [vmem:[%s2882_s1 + $0x528] sm:$0xff]  ;;  %v1454_v43 = vld [vmem:[%s2882_s1 + $0x520] sm:$0xff] }
  0x21   : > { %2667 = vmatmul.mubr.msk.f32.vlgmr.msra.gmra.mxu0 %vm1019_vm2, %v848_v10  ;;  %1579 = vmatprep.subr.mxu0 %v1351_v15  ;;  %v1323_v42 = vld [vmem:[%s2882_s1 + $0x108] sm:$0xff]  ;;  %v1322_v44 = vld [vmem:[%s2882_s1 + $0x100] sm:$0xff] }
  0x22   : > { %1580 = vmatpush1.msra.mxu0 %v1350_v16  ;;  %1657 = vmatpush1.msra.mxu1 %v1466_v31  ;;  %v1451_v45 = vld [vmem:[%s2882_s1 + $0x508] sm:$0xff]  ;;  %v1450_v47 = vld [vmem:[%s2882_s1 + $0x500] sm:$0xff] }
  0x23   : > { %1581 = vmatprep.subr.mxu0 %v1347_v17  ;;  %1658 = vmatprep.subr.mxu1 %v1463_v33  ;;  %v1319_v46 = vld [vmem:[%s2882_s1 + $0xe8] sm:$0xff]  ;;  %v1318_v48 = vld [vmem:[%s2882_s1 + $0xe0] sm:$0xff] }
  0x24   : > { %1582 = vmatpush1.msra.mxu0 %v1346_v19  ;;  %1659 = vmatpush1.msra.mxu1 %v1462_v35  ;;  %v1447_v49 = vld [vmem:[%s2882_s1 + $0x4e8] sm:$0xff]  ;;  %v1446_v51 = vld [vmem:[%s2882_s1 + $0x4e0] sm:$0xff]  ;;  %v1180_v19 = vshrl.u32 %v1179_v18, 7 }
  0x25   : > { %1583 = vmatprep.subr.mxu0 %v1343_v21  ;;  %1660 = vmatprep.subr.mxu1 %v1459_v37  ;;  %v1315_v50 = vld [vmem:[%s2882_s1 + $0xc8] sm:$0xff]  ;;  %v1314_v52 = vld [vmem:[%s2882_s1 + $0xc0] sm:$0xff] }
  0x26   : > { %1584 = vmatpush1.msra.mxu0 %v1342_v23  ;;  %1661 = vmatpush1.msra.mxu1 %v1458_v39  ;;  %v1443_v53 = vld [vmem:[%s2882_s1 + $0x4c8] sm:$0xff]  ;;  %v1442_v55 = vld [vmem:[%s2882_s1 + $0x4c0] sm:$0xff]  ;;  %v2957_v22 = vsub.s32 0, %v1180_v19  ;;  %v2959_v25 = vsub.s32 1, %v1180_v19 }
  0x27   : > { %1585 = vmatprep.subr.mxu0 %v1339_v26  ;;  %1662 = vmatprep.subr.mxu1 %v1455_v41  ;;  %v1311_v54 = vld [vmem:[%s2882_s1 + $0xa8] sm:$0xff]  ;;  %v1310_v56 = vld [vmem:[%s2882_s1 + $0xa0] sm:$0xff] }
  0x28   : > { %1586 = vmatpush1.msra.mxu0 %v1338_v28  ;;  %1663 = vmatpush1.msra.mxu1 %v1454_v43  ;;  %v1439_v57 = vld [vmem:[%s2882_s1 + $0x4a8] sm:$0xff]  ;;  %v1438_v59 = vld [vmem:[%s2882_s1 + $0x4a0] sm:$0xff]  ;;  %v2962_v28 = vsub.s32 2, %v1180_v19 }
  0x29   : > { %1587 = vmatprep.subr.mxu0 %v1335_v30  ;;  %1664 = vmatprep.subr.mxu1 %v1451_v45  ;;  %v1307_v58 = vld [vmem:[%s2882_s1 + $0x88] sm:$0xff]  ;;  %v1306_v60 = vld [vmem:[%s2882_s1 + $0x80] sm:$0xff] }
  0x2a   : > { %1588 = vmatpush1.msra.mxu0 %v1334_v32  ;;  %1665 = vmatpush1.msra.mxu1 %v1450_v47  ;;  %v1435_v61 = vld [vmem:[%s2882_s1 + $0x488] sm:$0xff]  ;;  %v1434_v63 = vld [vmem:[%s2882_s1 + $0x480] sm:$0xff]  ;;  %v2965_v32 = vsub.s32 3, %v1180_v19 }
  0x2b   : > { %1589 = vmatprep.subr.mxu0 %v1331_v34  ;;  %1666 = vmatprep.subr.mxu1 %v1447_v49  ;;  %v1303_v62 = vld [vmem:[%s2882_s1 + $0x68] sm:$0xff]  ;;  %v1302_v1 = vld [vmem:[%s2882_s1 + $0x60] sm:$0xff] }
  0x2c   : > { %1590 = vmatpush1.msra.mxu0 %v1330_v36  ;;  %1667 = vmatpush1.msra.mxu1 %v1446_v51  ;;  %v1431_v2 = vld [vmem:[%s2882_s1 + $0x468] sm:$0xff]  ;;  %v1430_v4 = vld [vmem:[%s2882_s1 + $0x460] sm:$0xff] }
  0x2d   : > { %1591 = vmatprep.subr.mxu0 %v1327_v38  ;;  %1668 = vmatprep.subr.mxu1 %v1443_v53  ;;  %v1299_v3 = vld [vmem:[%s2882_s1 + $0x48] sm:$0xff]  ;;  %v1298_v5 = vld [vmem:[%s2882_s1 + $0x40] sm:$0xff] }
  0x2e   : > { %1592 = vmatpush1.msra.mxu0 %v1326_v40  ;;  %1669 = vmatpush1.msra.mxu1 %v1442_v55  ;;  %v1427_v6 = vld [vmem:[%s2882_s1 + $0x448] sm:$0xff]  ;;  %v1426_v8 = vld [vmem:[%s2882_s1 + $0x440] sm:$0xff] }
  0x2f   : > { %1593 = vmatprep.subr.mxu0 %v1323_v42  ;;  %1670 = vmatprep.subr.mxu1 %v1439_v57  ;;  %v1295_v7 = vld [vmem:[%s2882_s1 + $0x28] sm:$0xff]  ;;  %v1294_v9 = vld [vmem:[%s2882_s1 + $0x20] sm:$0xff] }
  0x30   : > { %1594 = vmatpush1.msra.mxu0 %v1322_v44  ;;  %1671 = vmatpush1.msra.mxu1 %v1438_v59  ;;  %v1423_v10 = vld [vmem:[%s2882_s1 + $0x428] sm:$0xff]  ;;  %v1422_v12 = vld [vmem:[%s2882_s1 + $0x420] sm:$0xff] }
  0x31   : > { %1595 = vmatprep.subr.mxu0 %v1319_v46  ;;  %1672 = vmatprep.subr.mxu1 %v1435_v61  ;;  %v1291_v11 = vld [vmem:[%s2882_s1 + $0x8] sm:$0xff]  ;;  %v1290_v13 = vld [vmem:[%s2882_s1] sm:$0xff] }
  0x32   : > { %1596 = vmatpush1.msra.mxu0 %v1318_v48  ;;  %1673 = vmatpush1.msra.mxu1 %v1434_v63  ;;  %v1419_v14 = vld [vmem:[%s2882_s1 + $0x408] sm:$0xff]  ;;  %v1418_v16 = vld [vmem:[%s2882_s1 + $0x400] sm:$0xff] }
  0x33   : > { %1597 = vmatprep.subr.mxu0 %v1315_v50  ;;  %1674 = vmatprep.subr.mxu1 %v1431_v2  ;;  %v1415_v15 = vld [vmem:[%s2882_s1 + $0x3e8] sm:$0xff]  ;;  %v1414_v17 = vld [vmem:[%s2882_s1 + $0x3e0] sm:$0xff] }
  0x34   : > { %1598 = vmatpush1.msra.mxu0 %v1314_v52  ;;  %1675 = vmatpush1.msra.mxu1 %v1430_v4  ;;  %v1177_v24 = vld [vmem:[%s790_s23] sm:$0xf]  ;;  %v1411_v61 = vld [vmem:[%s2882_s1 + $0x3c8] sm:$0xff]  ;;  %s815_s23 = scalar_lea.vmem %s3487_s10, %s2951_s20 }
  0x35   : > { %1599 = vmatprep.subr.mxu0 %v1311_v54  ;;  %1676 = vmatprep.subr.mxu1 %v1427_v6  ;;  %v1182_v27 = vrot.slane %v1177_v24, %v2957_v22  ;;  %v1186_v31 = vrot.slane %v1177_v24, %v2959_v25  ;;  %v1190_v36 = vrot.slane %v1177_v24, %v2962_v28  ;;  %v1410_v63 = vld [vmem:[%s2882_s1 + $0x3c0] sm:$0xff]  ;;  %v1407_v2 = vld [vmem:[%s2882_s1 + $0x3a8] sm:$0xff] }
  0x36   : > { %1600 = vmatpush1.msra.mxu0 %v1310_v56  ;;  %1677 = vmatpush1.msra.mxu1 %v1426_v8  ;;  %v1194_v41 = vrot.slane %v1177_v24, %v2965_v32  ;;  %v1406_v4 = vld [vmem:[%s2882_s1 + $0x3a0] sm:$0xff]  ;;  %v1403_v6 = vld [vmem:[%s2882_s1 + $0x388] sm:$0xff] }
  0x37   : > { %1601 = vmatprep.subr.mxu0 %v1307_v58  ;;  %1678 = vmatprep.subr.mxu1 %v1423_v10  ;;  %v1402_v8 = vld [vmem:[%s2882_s1 + $0x380] sm:$0xff]  ;;  %v1399_v10 = vld [vmem:[%s2882_s1 + $0x368] sm:$0xff] }
  0x38   : > { %1602 = vmatpush1.msra.mxu0 %v1306_v60  ;;  %1679 = vmatpush1.msra.mxu1 %v1422_v12  ;;  %v1398_v12 = vld [vmem:[%s2882_s1 + $0x360] sm:$0xff]  ;;  %v1391_v18 = vld [vmem:[%s2882_s1 + $0x328] sm:$0xff] }
  0x39   : > { %1603 = vmatprep.subr.mxu0 %v1303_v62  ;;  %1680 = vmatprep.subr.mxu1 %v1419_v14  ;;  %v1539_v62 = vld [vmem:[%s2882_s1 + $0x7c8] sm:$0xf] }
  0x3a   : > { %1604 = vmatpush1.msra.mxu0 %v1302_v1  ;;  %1681 = vmatpush1.msra.mxu1 %v1418_v16  ;;  %v1538_v1 = vld [vmem:[%s2882_s1 + $0x7c0] sm:$0xf]  ;;  %v1395_v14 = vld [vmem:[%s2882_s1 + $0x348] sm:$0xff] }
  0x3b   : > { %1605 = vmatprep.subr.mxu0 %v1299_v3  ;;  %2668 = vmatprep.subr.msk.mxu1 %vm868_vm0, %v1539_v62  ;;  %v1535_v3 = vld [vmem:[%s2882_s1 + $0x7a8] sm:$0xff]  ;;  %v1394_v16 = vld [vmem:[%s2882_s1 + $0x340] sm:$0xff] }
  0x3c   : > { %1606 = vmatpush1.msra.mxu0 %v1298_v5  ;;  %2669 = vmatpush2.msk.msra.mxu1 %vm868_vm0, %v1538_v1  ;;  %v1534_v5 = vld [vmem:[%s2882_s1 + $0x7a0] sm:$0xff]  ;;  %v1519_v19 = vld [vmem:[%s2882_s1 + $0x728] sm:$0xff] }
  0x3d   : > { %1607 = vmatprep.subr.mxu0 %v1295_v7  ;;  %1686 = vmatprep.subr.mxu1 %v1535_v3  ;;  %v1531_v7 = vld [vmem:[%s2882_s1 + $0x788] sm:$0xff]  ;;  %v1354_v1 = vld [vmem:[%s2882_s1 + $0x200] sm:$0xff]  ;;  %v1353_v3 = vld [vmem:[%s2882_s1 + $0x1f8] sm:$0xff] }
  0x3e   : > { %1608 = vmatpush1.msra.mxu0 %v1294_v9  ;;  %1687 = vmatpush2.msra.mxu1 %v1534_v5  ;;  %v1530_v9 = vld [vmem:[%s2882_s1 + $0x780] sm:$0xff]  ;;  %v1515_v24 = vld [vmem:[%s2882_s1 + $0x708] sm:$0xff] }
  0x3f   : > { %1609 = vmatprep.subr.mxu0 %v1291_v11  ;;  %1688 = vmatprep.subr.mxu1 %v1531_v7  ;;  %v1527_v11 = vld [vmem:[%s2882_s1 + $0x768] sm:$0xff] }
  0x40   : > { %1610 = vmatpush1.msra.mxu0 %v1290_v13  ;;  %1689 = vmatpush2.msra.mxu1 %v1530_v9  ;;  %v1526_v13 = vld [vmem:[%s2882_s1 + $0x760] sm:$0xff]  ;;  %v1355_v62 = vld [vmem:[%s2882_s1 + $0x208] sm:$0xff] }
  0x41   : > { %1611 = vmatprep.subr.mxu0 %v1415_v15  ;;  %1690 = vmatprep.subr.mxu1 %v1527_v11  ;;  %v1523_v15 = vld [vmem:[%s2882_s1 + $0x748] sm:$0xff] }
  0x42   : > { %1612 = vmatpush2.msra.mxu0 %v1414_v17  ;;  %1691 = vmatpush2.msra.mxu1 %v1526_v13  ;;  %v1522_v17 = vld [vmem:[%s2882_s1 + $0x740] sm:$0xff] }
  0x43   : > { %1613 = vmatprep.subr.mxu0 %v1411_v61  ;;  %1692 = vmatprep.subr.mxu1 %v1523_v15  ;;  %v1486_v61 = vld [vmem:[%s2882_s1 + $0x620] sm:$0xff] }
  0x44   : > { %1614 = vmatpush2.msra.mxu0 %v1410_v63  ;;  %1693 = vmatpush2.msra.mxu1 %v1522_v17  ;;  %v1483_v63 = vld [vmem:[%s2882_s1 + $0x608] sm:$0xff]  ;;  %v1204_v13 = vld [vmem:[%s798_s19] sm:$0xf]  ;;  %s811_s19 = scalar_lea.vmem %s3486_s9, %s2951_s20 }
  0x45   : > { %1615 = vmatprep.subr.mxu0 %v1407_v2  ;;  %1694 = vmatprep.subr.mxu1 %v1519_v19  ;;  %v1482_v2 = vld [vmem:[%s2882_s1 + $0x600] sm:$0xff] }
  0x46   : > { %1616 = vmatpush2.msra.mxu0 %v1406_v4  ;;  %v1481_v4 = vld [vmem:[%s2882_s1 + $0x5f8] sm:$0xff] }
  0x47   : > { %1617 = vmatprep.subr.mxu0 %v1403_v6 }
  0x48   : > { %1618 = vmatpush2.msra.mxu0 %v1402_v8 }
  0x49   : > { %1619 = vmatprep.subr.mxu0 %v1399_v10 }
  0x4a   : > { %1620 = vmatpush2.msra.mxu0 %v1398_v12  ;;  %v1203_v12 = vld [vmem:[%s794_s0] sm:$0xf]  ;;  %s807_s0 = scalar_lea.vmem %s3485_s8, %s2951_s20  ;;  %s2683_s20 = smul.u32 200, %s3504_s24 }
  0x4b   : > { %1621 = vmatprep.subr.mxu0 %v1395_v14  ;;  %v1248_v14 = vrot.slane %v1203_v12, %v2959_v25  ;;  %v1256_v15 = vrot.slane %v1203_v12, %v2965_v32  ;;  %v1252_v17 = vrot.slane %v1203_v12, %v2962_v28 }
  0x4c   : > { %1622 = vmatpush2.msra.mxu0 %v1394_v16  ;;  %v1244_v16 = vrot.slane %v1203_v12, %v2957_v22  ;;  %v1320_v12 = vld [vmem:[%s2882_s1 + $0xf0] sm:$0xff]  ;;  %s3373_s29 = scalar_lea.vmem %s3492_s15, %s2683_s20 }
  0x4d   : > { %1623 = vmatprep.subr.mxu0 %v1391_v18 }
  0xd5   : > { %v943_v20 = vpop.f32.mrf.mxu0 }
  0xd7   : > { %v945_v21 = vpop.f32.mrf.mxu0 }
  0xd9   : > { %v1014_v23 = vpop.f32.mrf.mxu0 }
  0xdb   : > { %v1016_v26 = vpop.f32.mrf.mxu0 }
  0xdd   : > { %v1101_v29 = vpop.f32.mrf.mxu0 }
  0xde   : > { %v1102_v30 = vadd.f32 %v1101_v29, %v943_v20  ;;  %v1390_v20 = vld [vmem:[%s2882_s1 + $0x320] sm:$0xff]  ;;  %v1383_v29 = vld [vmem:[%s2882_s1 + $0x2e8] sm:$0xff] }
  0xdf   : > { %v1103_v33 = vpop.f32.mrf.mxu0  ;;  %1624 = vmatpush2.msra.mxu0 %v1390_v20 }
  0xe0   : > { %v1199_v34 = vadd.f32 %v1182_v27, %v1102_v30  ;;  %v1104_v35 = vadd.f32 %v1103_v33, %v945_v21  ;;  %v1518_v21 = vld [vmem:[%s2882_s1 + $0x720] sm:$0xff]  ;;  %v1511_v30 = vld [vmem:[%s2882_s1 + $0x6e8] sm:$0xff] }
  0xe1   : > { %v1172_v37 = vpop.f32.mrf.mxu0  ;;  %1695 = vmatpush2.msra.mxu1 %v1518_v21  ;;  %v1514_v27 = vld [vmem:[%s2882_s1 + $0x700] sm:$0xff] }
  0xe2   : > { %v2968_v38 = vmax.f32 %v1199_v34, 0.0  ;;  %v1200_v39 = vadd.f32 %v1186_v31, %v1104_v35  ;;  %v1173_v40 = vadd.f32 %v1172_v37, %v1014_v23  ;;  %v1387_v23 = vld [vmem:[%s2882_s1 + $0x308] sm:$0xff]  ;;  %1696 = vmatprep.subr.mxu1 %v1515_v24  ;;  %v1382_v31 = vld [vmem:[%s2882_s1 + $0x2e0] sm:$0xff]  ;;  %v1273_v24 = vrot.slane %v1204_v13, %v2959_v25 }
  0xe3   : > { %v1174_v42 = vpop.f32.mrf.mxu0  ;;  %1625 = vmatprep.subr.mxu0 %v1387_v23  ;;  %1697 = vmatpush2.msra.mxu1 %v1514_v27  ;;  %v1510_v33 = vld [vmem:[%s2882_s1 + $0x6e0] sm:$0xff]  ;;  %v1379_v34 = vld [vmem:[%s2882_s1 + $0x2c8] sm:$0xff]  ;;  %v1269_v27 = vrot.slane %v1204_v13, %v2957_v22 }
  0xe4   : > { %v2971_v43 = vmax.f32 %v1200_v39, 0.0  ;;  %v1201_v44 = vadd.f32 %v1190_v36, %v1173_v40  ;;  %v1175_v45 = vadd.f32 %v1174_v42, %v1016_v26  ;;  %v1216_v46 = vmul.f32 %v2968_v38, %v2968_v38  ;;  %v1386_v26 = vld [vmem:[%s2882_s1 + $0x300] sm:$0xff]  ;;  %v1507_v35 = vld [vmem:[%s2882_s1 + $0x6c8] sm:$0xff]  ;;  %1698 = vmatprep.subr.mxu1 %v1511_v30 }
  0xe5   : > { %1626 = vmatpush2.msra.mxu0 %v1386_v26  ;;  %v1378_v36 = vld [vmem:[%s2882_s1 + $0x2c0] sm:$0xff]  ;;  %1699 = vmatpush2.msra.mxu1 %v1510_v33  ;;  %v1375_v39 = vld [vmem:[%s2882_s1 + $0x2a8] sm:$0xff]  ;;  %v1281_v26 = vrot.slane %v1204_v13, %v2965_v32 }
  0xe6   : > { %v2975_v47 = vmax.f32 %v1201_v44, 0.0  ;;  %v1202_v48 = vadd.f32 %v1194_v41, %v1175_v45  ;;  %v1209_v49 = vadd.f32 %v2971_v43, %v2968_v38  ;;  %v1217_v50 = vmul.f32 %v2971_v43, %v2971_v43  ;;  %1627 = vmatprep.subr.mxu0 %v1383_v29  ;;  %v1506_v37 = vld [vmem:[%s2882_s1 + $0x6c0] sm:$0xff]  ;;  %v1503_v40 = vld [vmem:[%s2882_s1 + $0x6a8] sm:$0xff]  ;;  %1700 = vmatprep.subr.mxu1 %v1507_v35 }
  0xe7   : > { %1628 = vmatpush2.msra.mxu0 %v1382_v31  ;;  %v1374_v41 = vld [vmem:[%s2882_s1 + $0x2a0] sm:$0xff]  ;;  %1701 = vmatpush2.msra.mxu1 %v1506_v37  ;;  %v1371_v44 = vld [vmem:[%s2882_s1 + $0x288] sm:$0xff]  ;;  %v1277_v29 = vrot.slane %v1204_v13, %v2962_v28  ;;  %v1448_v13 = vld [vmem:[%s2882_s1 + $0x4f0] sm:$0xff] }
  0xe8   : > { %v2981_v51 = vmax.f32 %v1202_v48, 0.0  ;;  %v1210_v52 = vadd.f32 %v1209_v49, %v2975_v47  ;;  %v1218_v53 = vmul.f32 %v2975_v47, %v2975_v47  ;;  %v1220_v54 = vadd.f32 %v1217_v50, %v1216_v46  ;;  %1629 = vmatprep.subr.mxu0 %v1379_v34  ;;  %v1502_v42 = vld [vmem:[%s2882_s1 + $0x6a0] sm:$0xff]  ;;  %v1499_v45 = vld [vmem:[%s2882_s1 + $0x688] sm:$0xff]  ;;  %1702 = vmatprep.subr.mxu1 %v1503_v40  ;;  %v1352_v40 = vld [vmem:[%s2882_s1 + $0x1f0] sm:$0xff] }
  0xe9   : > { %1630 = vmatpush2.msra.mxu0 %v1378_v36  ;;  %v1370_v46 = vld [vmem:[%s2882_s1 + $0x280] sm:$0xff]  ;;  %1703 = vmatpush2.msra.mxu1 %v1502_v42  ;;  %v1367_v49 = vld [vmem:[%s2882_s1 + $0x268] sm:$0xff]  ;;  %v1349_v42 = vld [vmem:[%s2882_s1 + $0x1d8] sm:$0xff] }
  0xea   : > { %v1212_v55 = vsel %vm1211_vm3, %v2981_v51, 0.0  ;;  %v1219_v56 = vmul.f32 %v2981_v51, %v2981_v51  ;;  %v1221_v58 = vadd.f32 %v1220_v54, %v1218_v53  ;;  %1631 = vmatprep.subr.mxu0 %v1375_v39  ;;  %v1498_v48 = vld [vmem:[%s2882_s1 + $0x680] sm:$0xff]  ;;  %v1495_v50 = vld [vmem:[%s2882_s1 + $0x668] sm:$0xff]  ;;  %1704 = vmatprep.subr.mxu1 %v1499_v45  ;;  %v1348_v45 = vld [vmem:[%s2882_s1 + $0x1d0] sm:$0xff] }
  0xeb   : > { %v1213_v57 = vadd.f32 %v1212_v55, %v1210_v52  ;;  %1632 = vmatpush2.msra.mxu0 %v1374_v41  ;;  %v1366_v52 = vld [vmem:[%s2882_s1 + $0x260] sm:$0xff]  ;;  %1705 = vmatpush2.msra.mxu1 %v1498_v48  ;;  %v1363_v54 = vld [vmem:[%s2882_s1 + $0x248] sm:$0xff]  ;;  %v1480_v41 = vld [vmem:[%s2882_s1 + $0x5f0] sm:$0xff] }
  0xec   : > { %v1222_v59 = vsel %vm1211_vm3, %v1219_v56, 0.0  ;;  %1633 = vmatprep.subr.mxu0 %v1371_v44  ;;  %v1494_v53 = vld [vmem:[%s2882_s1 + $0x660] sm:$0xff]  ;;  %v1491_v55 = vld [vmem:[%s2882_s1 + $0x648] sm:$0xff]  ;;  %1706 = vmatprep.subr.mxu1 %v1495_v50  ;;  %v1477_v44 = vld [vmem:[%s2882_s1 + $0x5d8] sm:$0xff] }
  0xed   : > { %1214 = vadd.xlane.f32.xlu0 %v1213_v57  ;;  %v1223_v60 = vadd.f32 %v1222_v59, %v1221_v58  ;;  %1634 = vmatpush2.msra.mxu0 %v1370_v46  ;;  %v1362_v56 = vld [vmem:[%s2882_s1 + $0x240] sm:$0xff]  ;;  %v1359_v58 = vld [vmem:[%s2882_s1 + $0x228] sm:$0xff]  ;;  %v1476_v46 = vld [vmem:[%s2882_s1 + $0x5d0] sm:$0xff] }
  0xee   : > { %1635 = vmatprep.subr.mxu0 %v1367_v49  ;;  %v1490_v57 = vld [vmem:[%s2882_s1 + $0x640] sm:$0xff]  ;;  %1707 = vmatpush2.msra.mxu1 %v1494_v53  ;;  %v1487_v59 = vld [vmem:[%s2882_s1 + $0x628] sm:$0xff]  ;;  %v1345_v48 = vld [vmem:[%s2882_s1 + $0x1b8] sm:$0xff] }
  0xef   : > { %1636 = vmatpush2.msra.mxu0 %v1366_v52  ;;  %1708 = vmatprep.subr.mxu1 %v1491_v55  ;;  %v1473_v49 = vld [vmem:[%s2882_s1 + $0x5b8] sm:$0xff]  ;;  %v1344_v50 = vld [vmem:[%s2882_s1 + $0x1b0] sm:$0xff] }
  0xf0   : > { %1637 = vmatprep.subr.mxu0 %v1363_v54  ;;  %1709 = vmatpush2.msra.mxu1 %v1490_v57  ;;  %v1472_v52 = vld [vmem:[%s2882_s1 + $0x5b0] sm:$0xff]  ;;  %v1341_v53 = vld [vmem:[%s2882_s1 + $0x198] sm:$0xff] }
  0xf1   : > { %1224 = vadd.xlane.f32.xlu0 %v1223_v60  ;;  %v1358_v60 = vld [vmem:[%s2882_s1 + $0x220] sm:$0xff]  ;;  %1638 = vmatpush2.msra.mxu0 %v1362_v56  ;;  %v1469_v54 = vld [vmem:[%s2882_s1 + $0x598] sm:$0xff]  ;;  %v1340_v55 = vld [vmem:[%s2882_s1 + $0x190] sm:$0xff] }
  0xf2   : > { %1639 = vmatprep.subr.mxu0 %v1359_v58  ;;  %1710 = vmatprep.subr.mxu1 %v1487_v59  ;;  %v1468_v56 = vld [vmem:[%s2882_s1 + $0x590] sm:$0xff]  ;;  %v1337_v57 = vld [vmem:[%s2882_s1 + $0x178] sm:$0xff] }
  0xf3   : > { %1640 = vmatpush2.msra.mxu0 %v1358_v60  ;;  %1711 = vmatpush2.msra.mxu1 %v1486_v61  ;;  %v1465_v58 = vld [vmem:[%s2882_s1 + $0x578] sm:$0xff]  ;;  %v1336_v59 = vld [vmem:[%s2882_s1 + $0x170] sm:$0xff] }
  0xf4   : > { %1641 = vmatprep.subr.mxu0 %v1355_v62  ;;  %1712 = vmatprep.subr.mxu1 %v1483_v63  ;;  %v1464_v60 = vld [vmem:[%s2882_s1 + $0x570] sm:$0xff]  ;;  %v1333_v61 = vld [vmem:[%s2882_s1 + $0x158] sm:$0xff] }
  0xf5   : > { %1642 = vmatpush2.msra.mxu0 %v1354_v1  ;;  %1713 = vmatpush2.msra.mxu1 %v1482_v2  ;;  %v1461_v62 = vld [vmem:[%s2882_s1 + $0x558] sm:$0xff]  ;;  %v1332_v63 = vld [vmem:[%s2882_s1 + $0x150] sm:$0xff] }
  0xf6   : > { %1721 = vmatprep.subr.mxu1 %v1353_v3  ;;  %1792 = vmatprep.subr.mxu0 %v1481_v4  ;;  %v1460_v1 = vld [vmem:[%s2882_s1 + $0x550] sm:$0xff]  ;;  %v1329_v2 = vld [vmem:[%s2882_s1 + $0x138] sm:$0xff] }
  0xf7   : > { %v1457_v3 = vld [vmem:[%s2882_s1 + $0x538] sm:$0xff]  ;;  %v1328_v4 = vld [vmem:[%s2882_s1 + $0x130] sm:$0xff] }
 0x176   : > { %v1215_v5 = vpop.xlane.xlu0 %1214 }
 0x177   : > { %v1226_v6 = vmul.f32 0.002, %v1215_v5  ;;  %v1456_v5 = vld [vmem:[%s2882_s1 + $0x530] sm:$0xff] }
 0x179   : > { %v1228_v8 = vmul.f32 %v1226_v6, %v1226_v6  ;;  %v1230_v18 = vsub.f32 %v2968_v38, %v1226_v6  ;;  %v1231_v19 = vsub.f32 %v2971_v43, %v1226_v6  ;;  %v1233_v20 = vsub.f32 %v2981_v51, %v1226_v6 }
 0x17a   : > { %v1225_v7 = vpop.xlane.xlu0 %1224  ;;  %v1232_v21 = vsub.f32 %v2975_v47, %v1226_v6  ;;  %v1325_v6 = vld [vmem:[%s2882_s1 + $0x118] sm:$0xff] }
 0x17b   : > { %v1227_v9 = vmul.f32 0.002, %v1225_v7  ;;  %v1453_v7 = vld [vmem:[%s2882_s1 + $0x518] sm:$0xff] }
 0x17d   : > { %v1229_v10 = vsub.f32 %v1227_v9, %v1228_v8  ;;  %v1324_v8 = vld [vmem:[%s2882_s1 + $0x110] sm:$0xff] }
 0x17e   : > { %v1452_v9 = vld [vmem:[%s2882_s1 + $0x510] sm:$0xff] }
 0x17f   : > { %v1234_v11 = vadd.f32 1e-05, %v1229_v10  ;;  %v1321_v10 = vld [vmem:[%s2882_s1 + $0xf8] sm:$0xff] }
 0x181   : > { %2711 = vrsqrt.f32 %v1234_v11  ;;  %v1449_v11 = vld [vmem:[%s2882_s1 + $0x4f8] sm:$0xff] }
 0x18e   : > { %v2712_v23 = vpop.eup %2711 }
 0x18f   : > { %v1237_v30 = vmul.f32 %v2712_v23, %v1231_v19  ;;  %v1239_v38 = vmul.f32 %v2712_v23, %v1233_v20  ;;  %v1236_v31 = vmul.f32 %v2712_v23, %v1230_v18  ;;  %v1238_v43 = vmul.f32 %v2712_v23, %v1232_v21  ;;  %v1313_v18 = vld [vmem:[%s2882_s1 + $0xb8] sm:$0xff]  ;;  %v1312_v20 = vld [vmem:[%s2882_s1 + $0xb0] sm:$0xff] }
 0x190   : > { %v1441_v19 = vld [vmem:[%s2882_s1 + $0x4b8] sm:$0xff]  ;;  %v1440_v21 = vld [vmem:[%s2882_s1 + $0x4b0] sm:$0xff] }
 0x191   : > { %v1262_v51 = vmul.f32 %v1248_v14, %v1237_v30  ;;  %v1264_v33 = vmul.f32 %v1256_v15, %v1239_v38  ;;  %v1261_v47 = vmul.f32 %v1244_v16, %v1236_v31  ;;  %v1263_v34 = vmul.f32 %v1252_v17, %v1238_v43  ;;  %v1317_v14 = vld [vmem:[%s2882_s1 + $0xd8] sm:$0xff]  ;;  %v1316_v16 = vld [vmem:[%s2882_s1 + $0xd0] sm:$0xff] }
 0x192   : > { %v1445_v15 = vld [vmem:[%s2882_s1 + $0x4d8] sm:$0xff]  ;;  %v1444_v17 = vld [vmem:[%s2882_s1 + $0x4d0] sm:$0xff] }
 0x193   : > { %v1287_v35 = vadd.f32 %v1273_v24, %v1262_v51  ;;  %v1289_v36 = vadd.f32 %v1281_v26, %v1264_v33  ;;  %v3075_v37 = vadd.f32 %v1269_v27, %v1261_v47  ;;  %v3077_v39 = vadd.f32 %v1277_v29, %v1263_v34  ;;  %v1309_v23 = vld [vmem:[%s2882_s1 + $0x98] sm:$0xff]  ;;  %v1308_v26 = vld [vmem:[%s2882_s1 + $0x90] sm:$0xff] }
 0x194   : > { %v1437_v24 = vld [vmem:[%s2882_s1 + $0x498] sm:$0xff]  ;;  %v1436_v27 = vld [vmem:[%s2882_s1 + $0x490] sm:$0xff] }
 0x195   : > { %1643 = vmatprep.mubr.f32.mxu0 %v1287_v35  ;;  %2670 = vmatprep.mubr.msk.f32.mxu1 %vm1211_vm3, %v1289_v36  ;;  %v1305_v29 = vld [vmem:[%s2882_s1 + $0x78] sm:$0xff]  ;;  %v1304_v38 = vld [vmem:[%s2882_s1 + $0x70] sm:$0xff] }
 0x196   : > { %1644 = vmatmul.mubr.f32.vlgmr.msra.gmra.mxu0 %v3075_v37  ;;  %1715 = vmatmul.mubr.f32.vlgmr.msra.gmra.mxu1 %v3077_v39  ;;  %v1433_v30 = vld [vmem:[%s2882_s1 + $0x478] sm:$0xff]  ;;  %v1432_v31 = vld [vmem:[%s2882_s1 + $0x470] sm:$0xff] }
 0x197   : > { %1722 = vmatpush1.msra.mxu1 %v1352_v40  ;;  %1793 = vmatpush1.msra.mxu0 %v1480_v41  ;;  %v1301_v43 = vld [vmem:[%s2882_s1 + $0x58] sm:$0xff]  ;;  %v1300_v33 = vld [vmem:[%s2882_s1 + $0x50] sm:$0xff] }
 0x198   : > { %1723 = vmatprep.subr.mxu1 %v1349_v42  ;;  %1785 = vmatprep.mubr.f32.mxu1 %v1287_v35  ;;  %v1429_v51 = vld [vmem:[%s2882_s1 + $0x458] sm:$0xff]  ;;  %v1428_v47 = vld [vmem:[%s2882_s1 + $0x450] sm:$0xff] }
 0x199   : > { %1794 = vmatprep.subr.mxu0 %v1477_v44  ;;  %2673 = vmatprep.mubr.msk.f32.mxu0 %vm1211_vm3, %v1289_v36  ;;  %v1297_v34 = vld [vmem:[%s2882_s1 + $0x38] sm:$0xff]  ;;  %v1296_v36 = vld [vmem:[%s2882_s1 + $0x30] sm:$0xff] }
 0x19a   : > { %1724 = vmatpush1.msra.mxu1 %v1348_v45  ;;  %1795 = vmatpush1.msra.mxu0 %v1476_v46  ;;  %v1425_v35 = vld [vmem:[%s2882_s1 + $0x438] sm:$0xff]  ;;  %v1424_v40 = vld [vmem:[%s2882_s1 + $0x430] sm:$0xff] }
 0x19b   : > { %1725 = vmatprep.subr.mxu1 %v1345_v48  ;;  %1796 = vmatprep.subr.mxu0 %v1473_v49  ;;  %v1293_v41 = vld [vmem:[%s2882_s1 + $0x18] sm:$0xff]  ;;  %v1292_v44 = vld [vmem:[%s2882_s1 + $0x10] sm:$0xff] }
 0x19c   : > { %1726 = vmatpush1.msra.mxu1 %v1344_v50  ;;  %1797 = vmatpush1.msra.mxu0 %v1472_v52  ;;  %v1421_v42 = vld [vmem:[%s2882_s1 + $0x418] sm:$0xff]  ;;  %v1420_v45 = vld [vmem:[%s2882_s1 + $0x410] sm:$0xff] }
 0x19d   : > { %1727 = vmatprep.subr.mxu1 %v1341_v53  ;;  %1798 = vmatprep.subr.mxu0 %v1469_v54  ;;  %v1417_v46 = vld [vmem:[%s2882_s1 + $0x3f8] sm:$0xff]  ;;  %v1416_v49 = vld [vmem:[%s2882_s1 + $0x3f0] sm:$0xff] }
 0x19e   : > { %1728 = vmatpush1.msra.mxu1 %v1340_v55  ;;  %1799 = vmatpush1.msra.mxu0 %v1468_v56  ;;  %v1541_v48 = vld [vmem:[%s2882_s1 + $0x7d8] sm:$0xf]  ;;  %v1540_v50 = vld [vmem:[%s2882_s1 + $0x7d0] sm:$0xf] }
 0x19f   : > { %1729 = vmatprep.subr.mxu1 %v1337_v57  ;;  %1800 = vmatprep.subr.mxu0 %v1465_v58  ;;  %v1413_v52 = vld [vmem:[%s2882_s1 + $0x3d8] sm:$0xff]  ;;  %v1412_v54 = vld [vmem:[%s2882_s1 + $0x3d0] sm:$0xff] }
 0x1a0   : > { %1730 = vmatpush1.msra.mxu1 %v1336_v59  ;;  %1801 = vmatpush1.msra.mxu0 %v1464_v60  ;;  %v1537_v53 = vld [vmem:[%s2882_s1 + $0x7b8] sm:$0xff]  ;;  %v1536_v55 = vld [vmem:[%s2882_s1 + $0x7b0] sm:$0xff] }
 0x1a1   : > { %1731 = vmatprep.subr.mxu1 %v1333_v61  ;;  %1802 = vmatprep.subr.mxu0 %v1461_v62  ;;  %v1409_v56 = vld [vmem:[%s2882_s1 + $0x3b8] sm:$0xff]  ;;  %v1408_v58 = vld [vmem:[%s2882_s1 + $0x3b0] sm:$0xff] }
 0x1a2   : > { %1732 = vmatpush1.msra.mxu1 %v1332_v63  ;;  %1803 = vmatpush1.msra.mxu0 %v1460_v1  ;;  %v1533_v57 = vld [vmem:[%s2882_s1 + $0x798] sm:$0xff]  ;;  %v1532_v59 = vld [vmem:[%s2882_s1 + $0x790] sm:$0xff] }
 0x1a3   : > { %1733 = vmatprep.subr.mxu1 %v1329_v2  ;;  %1804 = vmatprep.subr.mxu0 %v1457_v3  ;;  %v1405_v60 = vld [vmem:[%s2882_s1 + $0x398] sm:$0xff]  ;;  %v1404_v62 = vld [vmem:[%s2882_s1 + $0x390] sm:$0xff] }
 0x1a4   : > { %1734 = vmatpush1.msra.mxu1 %v1328_v4  ;;  %1805 = vmatpush1.msra.mxu0 %v1456_v5  ;;  %v1529_v61 = vld [vmem:[%s2882_s1 + $0x778] sm:$0xff]  ;;  %v1528_v63 = vld [vmem:[%s2882_s1 + $0x770] sm:$0xff] }
 0x1a5   : > { %1735 = vmatprep.subr.mxu1 %v1325_v6  ;;  %1806 = vmatprep.subr.mxu0 %v1453_v7  ;;  %v1401_v1 = vld [vmem:[%s2882_s1 + $0x378] sm:$0xff]  ;;  %v1400_v3 = vld [vmem:[%s2882_s1 + $0x370] sm:$0xff] }
 0x1a6   : > { %1736 = vmatpush1.msra.mxu1 %v1324_v8  ;;  %1807 = vmatpush1.msra.mxu0 %v1452_v9  ;;  %v1525_v2 = vld [vmem:[%s2882_s1 + $0x758] sm:$0xff]  ;;  %v1524_v4 = vld [vmem:[%s2882_s1 + $0x750] sm:$0xff] }
 0x1a7   : > { %1737 = vmatprep.subr.mxu1 %v1321_v10  ;;  %1808 = vmatprep.subr.mxu0 %v1449_v11  ;;  %v1397_v5 = vld [vmem:[%s2882_s1 + $0x358] sm:$0xff]  ;;  %v1396_v7 = vld [vmem:[%s2882_s1 + $0x350] sm:$0xff] }
 0x1a8   : > { %1738 = vmatpush1.msra.mxu1 %v1320_v12  ;;  %1809 = vmatpush1.msra.mxu0 %v1448_v13  ;;  %v1521_v6 = vld [vmem:[%s2882_s1 + $0x738] sm:$0xff]  ;;  %v1520_v8 = vld [vmem:[%s2882_s1 + $0x730] sm:$0xff] }
 0x1a9   : > { %1739 = vmatprep.subr.mxu1 %v1317_v14  ;;  %1810 = vmatprep.subr.mxu0 %v1445_v15  ;;  %v1393_v9 = vld [vmem:[%s2882_s1 + $0x338] sm:$0xff]  ;;  %v1392_v11 = vld [vmem:[%s2882_s1 + $0x330] sm:$0xff] }
 0x1aa   : > { %1740 = vmatpush1.msra.mxu1 %v1316_v16  ;;  %1811 = vmatpush1.msra.mxu0 %v1444_v17  ;;  %v1517_v10 = vld [vmem:[%s2882_s1 + $0x718] sm:$0xff]  ;;  %v1516_v12 = vld [vmem:[%s2882_s1 + $0x710] sm:$0xff] }
 0x1ab   : > { %1741 = vmatprep.subr.mxu1 %v1313_v18  ;;  %1812 = vmatprep.subr.mxu0 %v1441_v19  ;;  %v1389_v13 = vld [vmem:[%s2882_s1 + $0x318] sm:$0xff]  ;;  %v1388_v15 = vld [vmem:[%s2882_s1 + $0x310] sm:$0xff] }
 0x1ac   : > { %1742 = vmatpush1.msra.mxu1 %v1312_v20  ;;  %1813 = vmatpush1.msra.mxu0 %v1440_v21  ;;  %v1513_v14 = vld [vmem:[%s2882_s1 + $0x6f8] sm:$0xff]  ;;  %v1512_v16 = vld [vmem:[%s2882_s1 + $0x6f0] sm:$0xff] }
 0x1ad   : > { %1743 = vmatprep.subr.mxu1 %v1309_v23  ;;  %1814 = vmatprep.subr.mxu0 %v1437_v24  ;;  %v1385_v17 = vld [vmem:[%s2882_s1 + $0x2f8] sm:$0xff]  ;;  %v1384_v19 = vld [vmem:[%s2882_s1 + $0x2f0] sm:$0xff] }
 0x1ae   : > { %1744 = vmatpush1.msra.mxu1 %v1308_v26  ;;  %1815 = vmatpush1.msra.mxu0 %v1436_v27  ;;  %v1509_v18 = vld [vmem:[%s2882_s1 + $0x6d8] sm:$0xff]  ;;  %v1508_v20 = vld [vmem:[%s2882_s1 + $0x6d0] sm:$0xff] }
 0x1af   : > { %1745 = vmatprep.subr.mxu1 %v1305_v29  ;;  %1816 = vmatprep.subr.mxu0 %v1433_v30  ;;  %v1381_v21 = vld [vmem:[%s2882_s1 + $0x2d8] sm:$0xff]  ;;  %v1380_v24 = vld [vmem:[%s2882_s1 + $0x2d0] sm:$0xff] }
 0x1b0   : > { %1746 = vmatpush1.msra.mxu1 %v1304_v38  ;;  %1817 = vmatpush1.msra.mxu0 %v1432_v31  ;;  %v1505_v23 = vld [vmem:[%s2882_s1 + $0x6b8] sm:$0xff]  ;;  %v1504_v26 = vld [vmem:[%s2882_s1 + $0x6b0] sm:$0xff] }
 0x1b1   : > { %1747 = vmatprep.subr.mxu1 %v1301_v43  ;;  %1818 = vmatprep.subr.mxu0 %v1429_v51  ;;  %v1377_v27 = vld [vmem:[%s2882_s1 + $0x2b8] sm:$0xff]  ;;  %v1376_v30 = vld [vmem:[%s2882_s1 + $0x2b0] sm:$0xff] }
 0x1b2   : > { %1748 = vmatpush1.msra.mxu1 %v1300_v33  ;;  %1819 = vmatpush1.msra.mxu0 %v1428_v47  ;;  %v1501_v29 = vld [vmem:[%s2882_s1 + $0x698] sm:$0xff]  ;;  %v1500_v38 = vld [vmem:[%s2882_s1 + $0x690] sm:$0xff] }
 0x1b3   : > { %1749 = vmatprep.subr.mxu1 %v1297_v34  ;;  %1820 = vmatprep.subr.mxu0 %v1425_v35  ;;  %v1373_v31 = vld [vmem:[%s2882_s1 + $0x298] sm:$0xff]  ;;  %v1372_v51 = vld [vmem:[%s2882_s1 + $0x290] sm:$0xff] }
 0x1b4   : > { %1750 = vmatpush1.msra.mxu1 %v1296_v36  ;;  %1821 = vmatpush1.msra.mxu0 %v1424_v40  ;;  %v1497_v43 = vld [vmem:[%s2882_s1 + $0x678] sm:$0xff]  ;;  %v1496_v33 = vld [vmem:[%s2882_s1 + $0x670] sm:$0xff] }
 0x1b5   : > { %1751 = vmatprep.subr.mxu1 %v1293_v41  ;;  %1822 = vmatprep.subr.mxu0 %v1421_v42  ;;  %v1369_v47 = vld [vmem:[%s2882_s1 + $0x278] sm:$0xff]  ;;  %v1368_v35 = vld [vmem:[%s2882_s1 + $0x270] sm:$0xff] }
 0x1b6   : > { %1752 = vmatpush1.msra.mxu1 %v1292_v44  ;;  %1823 = vmatpush1.msra.mxu0 %v1420_v45  ;;  %v1493_v34 = vld [vmem:[%s2882_s1 + $0x658] sm:$0xff]  ;;  %v1492_v36 = vld [vmem:[%s2882_s1 + $0x650] sm:$0xff] }
 0x1b7   : > { %1753 = vmatprep.subr.mxu1 %v1417_v46  ;;  %2671 = vmatprep.subr.msk.mxu0 %vm868_vm0, %v1541_v48  ;;  %v1365_v40 = vld [vmem:[%s2882_s1 + $0x258] sm:$0xff]  ;;  %v1364_v42 = vld [vmem:[%s2882_s1 + $0x250] sm:$0xff] }
 0x1b8   : > { %1754 = vmatpush2.msra.mxu1 %v1416_v49  ;;  %2672 = vmatpush2.msk.msra.mxu0 %vm868_vm0, %v1540_v50  ;;  %v1489_v41 = vld [vmem:[%s2882_s1 + $0x638] sm:$0xff]  ;;  %v1488_v44 = vld [vmem:[%s2882_s1 + $0x630] sm:$0xff] }
 0x1b9   : > { %1755 = vmatprep.subr.mxu1 %v1413_v52  ;;  %1828 = vmatprep.subr.mxu0 %v1537_v53  ;;  %v1361_v45 = vld [vmem:[%s2882_s1 + $0x238] sm:$0xff]  ;;  %v1360_v48 = vld [vmem:[%s2882_s1 + $0x230] sm:$0xff] }
 0x1ba   : > { %1756 = vmatpush2.msra.mxu1 %v1412_v54  ;;  %1829 = vmatpush2.msra.mxu0 %v1536_v55  ;;  %v1485_v46 = vld [vmem:[%s2882_s1 + $0x618] sm:$0xff]  ;;  %v1484_v49 = vld [vmem:[%s2882_s1 + $0x610] sm:$0xff]  ;;  %v1979_v54 = vld [vmem:[%s3215_s28 + $0xe8] sm:$0xff] }
 0x1bb   : > { %1757 = vmatprep.subr.mxu1 %v1409_v56  ;;  %1830 = vmatprep.subr.mxu0 %v1533_v57  ;;  %v1357_v50 = vld [vmem:[%s2882_s1 + $0x218] sm:$0xff]  ;;  %v1356_v52 = vld [vmem:[%s2882_s1 + $0x210] sm:$0xff]  ;;  %v1975_v57 = vld [vmem:[%s3215_s28 + $0xc8] sm:$0xff] }
 0x1bc   : > { %1758 = vmatpush2.msra.mxu1 %v1408_v58  ;;  %1831 = vmatpush2.msra.mxu0 %v1532_v59  ;;  %v1981_v53 = vld [vmem:[%s3215_s28 + $0xf8] sm:$0xff]  ;;  %v1976_v56 = vld [vmem:[%s3215_s28 + $0xd0] sm:$0xff]  ;;  %v1974_v58 = vld [vmem:[%s3215_s28 + $0xc0] sm:$0xff] }
 0x1bd   : > { %1759 = vmatprep.subr.mxu1 %v1405_v60  ;;  %1832 = vmatprep.subr.mxu0 %v1529_v61  ;;  %v1977_v55 = vld [vmem:[%s3215_s28 + $0xd8] sm:$0xff]  ;;  %v1972_v60 = vld [vmem:[%s3215_s28 + $0xb0] sm:$0xff]  ;;  %v1971_v61 = vld [vmem:[%s3215_s28 + $0xa8] sm:$0xff] }
 0x1be   : > { %1760 = vmatpush2.msra.mxu1 %v1404_v62  ;;  %1833 = vmatpush2.msra.mxu0 %v1528_v63  ;;  %v1973_v59 = vld [vmem:[%s3215_s28 + $0xb8] sm:$0xff]  ;;  %v1970_v62 = vld [vmem:[%s3215_s28 + $0xa0] sm:$0xff] }
 0x1bf   : > { %1761 = vmatprep.subr.mxu1 %v1401_v1  ;;  %1834 = vmatprep.subr.mxu0 %v1525_v2  ;;  %v2045_v63 = vld [vmem:[%s3215_s28 + $0x2f8] sm:$0xff]  ;;  %v2044_v2 = vld [vmem:[%s3215_s28 + $0x2f0] sm:$0xff] }
 0x1c0   : > { %1762 = vmatpush2.msra.mxu1 %v1400_v3  ;;  %1835 = vmatpush2.msra.mxu0 %v1524_v4  ;;  %v1969_v1 = vld [vmem:[%s3215_s28 + $0x98] sm:$0xff]  ;;  %v1968_v3 = vld [vmem:[%s3215_s28 + $0x90] sm:$0xff]  ;;  %v2043_v4 = vld [vmem:[%s3215_s28 + $0x2e8] sm:$0xff] }
 0x1c1   : > { %1763 = vmatprep.subr.mxu1 %v1397_v5  ;;  %1836 = vmatprep.subr.mxu0 %v1521_v6  ;;  %v2042_v5 = vld [vmem:[%s3215_s28 + $0x2e0] sm:$0xff]  ;;  %v1967_v6 = vld [vmem:[%s3215_s28 + $0x88] sm:$0xff] }
 0x1c2   : > { %1764 = vmatpush2.msra.mxu1 %v1396_v7  ;;  %1837 = vmatpush2.msra.mxu0 %v1520_v8  ;;  %v2041_v7 = vld [vmem:[%s3215_s28 + $0x2d8] sm:$0xff]  ;;  %v1966_v8 = vld [vmem:[%s3215_s28 + $0x80] sm:$0xff] }
 0x1c3   : > { %1765 = vmatprep.subr.mxu1 %v1393_v9  ;;  %1838 = vmatprep.subr.mxu0 %v1517_v10  ;;  %v1965_v9 = vld [vmem:[%s3215_s28 + $0x78] sm:$0xff]  ;;  %v1964_v10 = vld [vmem:[%s3215_s28 + $0x70] sm:$0xff] }
 0x1c4   : > { %1766 = vmatpush2.msra.mxu1 %v1392_v11  ;;  %1839 = vmatpush2.msra.mxu0 %v1516_v12  ;;  %v1963_v11 = vld [vmem:[%s3215_s28 + $0x68] sm:$0xff]  ;;  %v1962_v12 = vld [vmem:[%s3215_s28 + $0x60] sm:$0xff] }
 0x1c5   : > { %1767 = vmatprep.subr.mxu1 %v1389_v13  ;;  %1840 = vmatprep.subr.mxu0 %v1513_v14  ;;  %v1961_v13 = vld [vmem:[%s3215_s28 + $0x58] sm:$0xff]  ;;  %v1960_v14 = vld [vmem:[%s3215_s28 + $0x50] sm:$0xff] }
 0x1c6   : > { %1768 = vmatpush2.msra.mxu1 %v1388_v15  ;;  %1841 = vmatpush2.msra.mxu0 %v1512_v16  ;;  %v1959_v15 = vld [vmem:[%s3215_s28 + $0x48] sm:$0xff]  ;;  %v1958_v16 = vld [vmem:[%s3215_s28 + $0x40] sm:$0xff] }
 0x1c7   : > { %1769 = vmatprep.subr.mxu1 %v1385_v17  ;;  %1842 = vmatprep.subr.mxu0 %v1509_v18  ;;  %v1957_v17 = vld [vmem:[%s3215_s28 + $0x38] sm:$0xff]  ;;  %v1956_v18 = vld [vmem:[%s3215_s28 + $0x30] sm:$0xff] }
 0x1c8   : > { %1770 = vmatpush2.msra.mxu1 %v1384_v19  ;;  %1843 = vmatpush2.msra.mxu0 %v1508_v20  ;;  %v1955_v19 = vld [vmem:[%s3215_s28 + $0x28] sm:$0xff]  ;;  %v1954_v20 = vld [vmem:[%s3215_s28 + $0x20] sm:$0xff] }
 0x1c9   : > { %1771 = vmatprep.subr.mxu1 %v1381_v21  ;;  %1844 = vmatprep.subr.mxu0 %v1505_v23  ;;  %v1953_v21 = vld [vmem:[%s3215_s28 + $0x18] sm:$0xff]  ;;  %v1952_v23 = vld [vmem:[%s3215_s28 + $0x10] sm:$0xff] }
 0x1ca   : > { %1772 = vmatpush2.msra.mxu1 %v1380_v24  ;;  %1845 = vmatpush2.msra.mxu0 %v1504_v26  ;;  %v1951_v24 = vld [vmem:[%s3215_s28 + $0x8] sm:$0xff]  ;;  %v1950_v26 = vld [vmem:[%s3215_s28] sm:$0xff] }
 0x1cb   : > { %1773 = vmatprep.subr.mxu1 %v1377_v27  ;;  %1846 = vmatprep.subr.mxu0 %v1501_v29  ;;  %v2013_v27 = vld [vmem:[%s3215_s28 + $0x1f8] sm:$0xff] }
 0x1cc   : > { %1774 = vmatpush2.msra.mxu1 %v1376_v30  ;;  %1847 = vmatpush2.msra.mxu0 %v1500_v38  ;;  %v1542_v30 = vld [vmem:[%s807_s0] sm:$0xf]  ;;  %s3396_s0 = sshll.u32 %s3504_s24, 1 }
 0x1cd   : > { %1775 = vmatprep.subr.mxu1 %v1373_v31  ;;  %1848 = vmatprep.subr.mxu0 %v1497_v43  ;;  %v1551_v38 = vrot.slane %v1542_v30, %v2959_v25  ;;  %v1547_v43 = vrot.slane %v1542_v30, %v2957_v22  ;;  %s832_s1 = scalar_lea.vmem %s3491_s14, %s3396_s0 }
 0x1ce   : > { %1776 = vmatpush2.msra.mxu1 %v1372_v51  ;;  %1849 = vmatpush2.msra.mxu0 %v1496_v33 }
 0x1cf   : > { %1777 = vmatprep.subr.mxu1 %v1369_v47  ;;  %1850 = vmatprep.subr.mxu0 %v1493_v34 }
 0x1d0   : > { %1778 = vmatpush2.msra.mxu1 %v1368_v35  ;;  %1851 = vmatpush2.msra.mxu0 %v1492_v36  ;;  %v1555_v36 = vrot.slane %v1542_v30, %v2962_v28 }
 0x1d1   : > { %1779 = vmatprep.subr.mxu1 %v1365_v40  ;;  %1852 = vmatprep.subr.mxu0 %v1489_v41  ;;  %v1559_v41 = vrot.slane %v1542_v30, %v2965_v32  ;;  %v2029_v30 = vld [vmem:[%s3215_s28 + $0x278] sm:$0xff] }
 0x1d2   : > { %1780 = vmatpush2.msra.mxu1 %v1364_v42  ;;  %1853 = vmatpush2.msra.mxu0 %v1488_v44 }
 0x1d3   : > { %1781 = vmatprep.subr.mxu1 %v1361_v45  ;;  %1854 = vmatprep.subr.mxu0 %v1485_v46 }
 0x1d4   : > { %1782 = vmatpush2.msra.mxu1 %v1360_v48  ;;  %1855 = vmatpush2.msra.mxu0 %v1484_v49 }
 0x1d5   : > { %1783 = vmatprep.subr.mxu1 %v1357_v50  ;;  %1857 = vmatmul.mubr.f32.vlgmr.msra.gmra.mxu0 %v3077_v39  ;;  %v1980_v39 = vld [vmem:[%s3215_s28 + $0xf0] sm:$0xff] }
 0x1d6   : > { %1784 = vmatpush2.msra.mxu1 %v1356_v52  ;;  %2065 = vmatprep.subr.mxu0 %v1981_v53 }
 0x1d7   : > { %1786 = vmatmul.mubr.f32.vlgmr.msra.gmra.mxu1 %v3075_v37  ;;  %v1978_v37 = vld [vmem:[%s3215_s28 + $0xe0] sm:$0xff]  ;;  %2066 = vmatpush1.msra.mxu0 %v1980_v39 }
 0x1d8   : > { %2067 = vmatprep.subr.mxu0 %v1979_v54  ;;  %2136 = vmatprep.subr.mxu1 %v2045_v63 }
 0x1d9   : > { %2068 = vmatpush1.msra.mxu0 %v1978_v37  ;;  %2137 = vmatpush1.msra.mxu1 %v2044_v2 }
 0x1da   : > { %2069 = vmatprep.subr.mxu0 %v1977_v55  ;;  %2138 = vmatprep.subr.mxu1 %v2043_v4  ;;  %v2012_v4 = vld [vmem:[%s3215_s28 + $0x1f0] sm:$0xff] }
 0x1db   : > { %2070 = vmatpush1.msra.mxu0 %v1976_v56  ;;  %2139 = vmatpush1.msra.mxu1 %v2042_v5  ;;  %v2040_v5 = vld [vmem:[%s3215_s28 + $0x2d0] sm:$0xff] }
 0x1dc   : > { %2071 = vmatprep.subr.mxu0 %v1975_v57  ;;  %2140 = vmatprep.subr.mxu1 %v2041_v7  ;;  %v2039_v7 = vld [vmem:[%s3215_s28 + $0x2c8] sm:$0xff] }
 0x1dd   : > { %2072 = vmatpush1.msra.mxu0 %v1974_v58  ;;  %2141 = vmatpush1.msra.mxu1 %v2040_v5  ;;  %v1984_v5 = vld [vmem:[%s3215_s28 + $0x110] sm:$0xff] }
 0x1de   : > { %2073 = vmatprep.subr.mxu0 %v1973_v59  ;;  %2142 = vmatprep.subr.mxu1 %v2039_v7  ;;  %v1983_v7 = vld [vmem:[%s3215_s28 + $0x108] sm:$0xff] }
 0x1df   : > { %2074 = vmatpush1.msra.mxu0 %v1972_v60 }
 0x1e0   : > { %2075 = vmatprep.subr.mxu0 %v1971_v61 }
 0x1e1   : > { %2076 = vmatpush1.msra.mxu0 %v1970_v62 }
 0x1e2   : > { %2077 = vmatprep.subr.mxu0 %v1969_v1 }
 0x1e3   : > { %2078 = vmatpush1.msra.mxu0 %v1968_v3 }
 0x1e4   : > { %2079 = vmatprep.subr.mxu0 %v1967_v6  ;;  %v2011_v6 = vld [vmem:[%s3215_s28 + $0x1e8] sm:$0xff] }
 0x1e5   : > { %2080 = vmatpush1.msra.mxu0 %v1966_v8  ;;  %v2010_v8 = vld [vmem:[%s3215_s28 + $0x1e0] sm:$0xff] }
 0x1e6   : > { %2081 = vmatprep.subr.mxu0 %v1965_v9  ;;  %v2038_v9 = vld [vmem:[%s3215_s28 + $0x2c0] sm:$0xff] }
 0x1e7   : > { %2082 = vmatpush1.msra.mxu0 %v1964_v10  ;;  %2143 = vmatpush1.msra.mxu1 %v2038_v9  ;;  %v2009_v10 = vld [vmem:[%s3215_s28 + $0x1d8] sm:$0xff]  ;;  %v1982_v9 = vld [vmem:[%s3215_s28 + $0x100] sm:$0xff] }
 0x1e8   : > { %2083 = vmatprep.subr.mxu0 %v1963_v11  ;;  %v2037_v11 = vld [vmem:[%s3215_s28 + $0x2b8] sm:$0xff] }
 0x1e9   : > { %2084 = vmatpush1.msra.mxu0 %v1962_v12  ;;  %2144 = vmatprep.subr.mxu1 %v2037_v11  ;;  %v2008_v12 = vld [vmem:[%s3215_s28 + $0x1d0] sm:$0xff] }
 0x1ea   : > { %2085 = vmatprep.subr.mxu0 %v1961_v13  ;;  %v2036_v13 = vld [vmem:[%s3215_s28 + $0x2b0] sm:$0xff] }
 0x1eb   : > { %2086 = vmatpush1.msra.mxu0 %v1960_v14  ;;  %2145 = vmatpush1.msra.mxu1 %v2036_v13  ;;  %v2007_v14 = vld [vmem:[%s3215_s28 + $0x1c8] sm:$0xff] }
 0x1ec   : > { %2087 = vmatprep.subr.mxu0 %v1959_v15  ;;  %v2035_v15 = vld [vmem:[%s3215_s28 + $0x2a8] sm:$0xff] }
 0x1ed   : > { %2088 = vmatpush1.msra.mxu0 %v1958_v16  ;;  %2146 = vmatprep.subr.mxu1 %v2035_v15  ;;  %v2006_v16 = vld [vmem:[%s3215_s28 + $0x1c0] sm:$0xff] }
 0x1ee   : > { %2089 = vmatprep.subr.mxu0 %v1957_v17  ;;  %v2034_v17 = vld [vmem:[%s3215_s28 + $0x2a0] sm:$0xff] }
 0x1ef   : > { %2090 = vmatpush1.msra.mxu0 %v1956_v18  ;;  %2147 = vmatpush1.msra.mxu1 %v2034_v17  ;;  %v2005_v18 = vld [vmem:[%s3215_s28 + $0x1b8] sm:$0xff] }
 0x1f0   : > { %2091 = vmatprep.subr.mxu0 %v1955_v19  ;;  %v2033_v19 = vld [vmem:[%s3215_s28 + $0x298] sm:$0xff] }
 0x1f1   : > { %2092 = vmatpush1.msra.mxu0 %v1954_v20  ;;  %2148 = vmatprep.subr.mxu1 %v2033_v19  ;;  %v2004_v20 = vld [vmem:[%s3215_s28 + $0x1b0] sm:$0xff]  ;;  %v1864_v19 = vld [vmem:[%s815_s23] sm:$0xf]  ;;  %s828_s23 = scalar_lea.vmem %s3490_s13, %s3396_s0 }
 0x1f2   : > { %2093 = vmatprep.subr.mxu0 %v1953_v21  ;;  %v2032_v21 = vld [vmem:[%s3215_s28 + $0x290] sm:$0xff] }
 0x1f3   : > { %2094 = vmatpush1.msra.mxu0 %v1952_v23  ;;  %2149 = vmatpush1.msra.mxu1 %v2032_v21  ;;  %v2003_v23 = vld [vmem:[%s3215_s28 + $0x1a8] sm:$0xff] }
 0x1f4   : > { %2095 = vmatprep.subr.mxu0 %v1951_v24  ;;  %v2031_v24 = vld [vmem:[%s3215_s28 + $0x288] sm:$0xff] }
 0x1f5   : > { %2096 = vmatpush1.msra.mxu0 %v1950_v26  ;;  %2150 = vmatprep.subr.mxu1 %v2031_v24  ;;  %v2002_v26 = vld [vmem:[%s3215_s28 + $0x1a0] sm:$0xff] }
 0x1f6   : > { %2097 = vmatprep.subr.mxu0 %v2013_v27  ;;  %v2030_v27 = vld [vmem:[%s3215_s28 + $0x280] sm:$0xff] }
 0x1f7   : > { %2098 = vmatpush2.msra.mxu0 %v2012_v4  ;;  %2151 = vmatpush1.msra.mxu1 %v2030_v27  ;;  %v2049_v4 = vld [vmem:[%s3215_s28 + $0x318] sm:$0xff] }
 0x1f8   : > { %2099 = vmatprep.subr.mxu0 %v2011_v6  ;;  %2152 = vmatprep.subr.mxu1 %v2029_v30  ;;  %v2048_v6 = vld [vmem:[%s3215_s28 + $0x310] sm:$0xff] }
 0x1f9   : > { %2100 = vmatpush2.msra.mxu0 %v2010_v8  ;;  %v2047_v8 = vld [vmem:[%s3215_s28 + $0x308] sm:$0xff] }
 0x1fa   : > { %2101 = vmatprep.subr.mxu0 %v2009_v10  ;;  %v2046_v10 = vld [vmem:[%s3215_s28 + $0x300] sm:$0xff] }
 0x1fb   : > { %2102 = vmatpush2.msra.mxu0 %v2008_v12 }
 0x1fc   : > { %2103 = vmatprep.subr.mxu0 %v2007_v14 }
 0x1fd   : > { %2104 = vmatpush2.msra.mxu0 %v2006_v16 }
 0x1fe   : > { %2105 = vmatprep.subr.mxu0 %v2005_v18  ;;  %v1863_v18 = vld [vmem:[%s811_s19] sm:$0xf]  ;;  %s824_s19 = scalar_lea.vmem %s3489_s12, %s3396_s0 }
 0x1ff   : > { %2106 = vmatpush2.msra.mxu0 %v2004_v20  ;;  %v1908_v20 = vrot.slane %v1863_v18, %v2959_v25  ;;  %v1916_v21 = vrot.slane %v1863_v18, %v2965_v32  ;;  %v1912_v24 = vrot.slane %v1863_v18, %v2962_v28 }
 0x200   : > { %2107 = vmatprep.subr.mxu0 %v2003_v23  ;;  %v1904_v23 = vrot.slane %v1863_v18, %v2957_v22  ;;  %v2258_v18 = vld [vmem:[%s3373_s29] sm:$0xff] }
 0x201   : > { %2108 = vmatpush2.msra.mxu0 %v2002_v26 }
 0x256   : > { %v1645_v29 = vpop.f32.mrf.mxu0  ;;  %v1716_v51 = vpop.f32.mrf.mxu1 }
 0x257   : > { %v1646_v47 = vadd.f32 %v1645_v29, %v1547_v43  ;;  %v2001_v29 = vld [vmem:[%s3215_s28 + $0x198] sm:$0xff]  ;;  %v1999_v43 = vld [vmem:[%s3215_s28 + $0x188] sm:$0xff] }
 0x258   : > { %v1647_v31 = vpop.f32.mrf.mxu0  ;;  %v1718_v34 = vpop.f32.mrf.mxu1  ;;  %2109 = vmatprep.subr.mxu0 %v2001_v29 }
 0x259   : > { %v1648_v33 = vadd.f32 %v1647_v31, %v1551_v38  ;;  %v1717_v40 = vadd.f32 %v1716_v51, %v1646_v47  ;;  %v2000_v38 = vld [vmem:[%s3215_s28 + $0x190] sm:$0xff]  ;;  %v2027_v51 = vld [vmem:[%s3215_s28 + $0x268] sm:$0xff]  ;;  %v2026_v47 = vld [vmem:[%s3215_s28 + $0x260] sm:$0xff] }
 0x25a   : > { %v2028_v31 = vld [vmem:[%s3215_s28 + $0x270] sm:$0xff]  ;;  %2110 = vmatpush2.msra.mxu0 %v2000_v38 }
 0x25b   : > { %v1719_v35 = vadd.f32 %v1718_v34, %v1648_v33  ;;  %v3265_v48 = vmax.f32 %v1717_v40, 0.0  ;;  %2153 = vmatpush1.msra.mxu1 %v2028_v31  ;;  %v1998_v33 = vld [vmem:[%s3215_s28 + $0x180] sm:$0xff]  ;;  %v1997_v34 = vld [vmem:[%s3215_s28 + $0x178] sm:$0xff]  ;;  %2111 = vmatprep.subr.mxu0 %v1999_v43  ;;  %v2024_v40 = vld [vmem:[%s3215_s28 + $0x250] sm:$0xff]  ;;  %v1933_v31 = vrot.slane %v1864_v19, %v2959_v25  ;;  %v1941_v43 = vrot.slane %v1864_v19, %v2965_v32 }
 0x25c   : > { %2154 = vmatprep.subr.mxu1 %v2027_v51  ;;  %2112 = vmatpush2.msra.mxu0 %v1998_v33  ;;  %v1929_v51 = vrot.slane %v1864_v19, %v2957_v22  ;;  %v1937_v33 = vrot.slane %v1864_v19, %v2962_v28  ;;  %v2273_v28 = vld [vmem:[%s3373_s29 + $0x78] sm:$0xff]  ;;  %v2272_v32 = vld [vmem:[%s3373_s29 + $0x70] sm:$0xff]  ;;  %v2282_v19 = vld [vmem:[%s3373_s29 + $0xc0] sm:$0xff] }
 0x25d   : > { %v3263_v42 = vmax.f32 %v1719_v35, 0.0  ;;  %v1876_v56 = vmul.f32 %v3265_v48, %v3265_v48  ;;  %v2025_v35 = vld [vmem:[%s3215_s28 + $0x258] sm:$0xff]  ;;  %2155 = vmatpush1.msra.mxu1 %v2026_v47  ;;  %2113 = vmatprep.subr.mxu0 %v1997_v34 }
 0x25e   : > { %2156 = vmatprep.subr.mxu1 %v2025_v35 }
 0x25f   : > { %v1877_v53 = vmul.f32 %v3263_v42, %v3263_v42  ;;  %v1869_v55 = vadd.f32 %v3263_v42, %v3265_v48  ;;  %2157 = vmatpush1.msra.mxu1 %v2024_v40 }
 0x261   : > { %v1880_v60 = vadd.f32 %v1877_v53, %v1876_v56  ;;  %v2020_v53 = vld [vmem:[%s3215_s28 + $0x230] sm:$0xff]  ;;  %v2018_v56 = vld [vmem:[%s3215_s28 + $0x220] sm:$0xff] }
 0x295   : > { %v1858_v44 = vpop.f32.mrf.mxu0 }
 0x297   : > { %v1787_v45 = vpop.f32.mrf.mxu1  ;;  %v1860_v39 = vpop.f32.mrf.mxu0 }
 0x298   : > { %v1788_v46 = vadd.f32 %v1787_v45, %v1555_v36  ;;  %v1996_v36 = vld [vmem:[%s3215_s28 + $0x170] sm:$0xff]  ;;  %v1994_v45 = vld [vmem:[%s3215_s28 + $0x160] sm:$0xff] }
 0x299   : > { %v1789_v49 = vpop.f32.mrf.mxu1  ;;  %2114 = vmatpush2.msra.mxu0 %v1996_v36 }
 0x29a   : > { %v1859_v50 = vadd.f32 %v1858_v44, %v1788_v46  ;;  %v1790_v52 = vadd.f32 %v1789_v49, %v1559_v41  ;;  %v1995_v41 = vld [vmem:[%s3215_s28 + $0x168] sm:$0xff]  ;;  %v2022_v46 = vld [vmem:[%s3215_s28 + $0x240] sm:$0xff]  ;;  %v1993_v49 = vld [vmem:[%s3215_s28 + $0x158] sm:$0xff] }
 0x29b   : > { %v2023_v44 = vld [vmem:[%s3215_s28 + $0x248] sm:$0xff]  ;;  %2115 = vmatprep.subr.mxu0 %v1995_v41 }
 0x29c   : > { %v3269_v54 = vmax.f32 %v1859_v50, 0.0  ;;  %v1861_v37 = vadd.f32 %v1860_v39, %v1790_v52  ;;  %v2021_v50 = vld [vmem:[%s3215_s28 + $0x238] sm:$0xff]  ;;  %2158 = vmatprep.subr.mxu1 %v2023_v44  ;;  %v1992_v52 = vld [vmem:[%s3215_s28 + $0x150] sm:$0xff]  ;;  %2116 = vmatpush2.msra.mxu0 %v1994_v45  ;;  %v1991_v39 = vld [vmem:[%s3215_s28 + $0x148] sm:$0xff] }
 0x29d   : > { %2159 = vmatpush1.msra.mxu1 %v2022_v46  ;;  %2117 = vmatprep.subr.mxu0 %v1993_v49  ;;  %v2271_v46 = vld [vmem:[%s3373_s29 + $0x68] sm:$0xff]  ;;  %v2270_v49 = vld [vmem:[%s3373_s29 + $0x60] sm:$0xff] }
 0x29e   : > { %v3275_v57 = vmax.f32 %v1861_v37, 0.0  ;;  %v1870_v58 = vadd.f32 %v1869_v55, %v3269_v54  ;;  %v1878_v59 = vmul.f32 %v3269_v54, %v3269_v54  ;;  %v2019_v37 = vld [vmem:[%s3215_s28 + $0x228] sm:$0xff]  ;;  %2160 = vmatprep.subr.mxu1 %v2021_v50  ;;  %v1990_v55 = vld [vmem:[%s3215_s28 + $0x140] sm:$0xff]  ;;  %2118 = vmatpush2.msra.mxu0 %v1992_v52  ;;  %v2269_v50 = vld [vmem:[%s3373_s29 + $0x58] sm:$0xff] }
 0x29f   : > { %2161 = vmatpush1.msra.mxu1 %v2020_v53  ;;  %2119 = vmatprep.subr.mxu0 %v1991_v39  ;;  %v2268_v52 = vld [vmem:[%s3373_s29 + $0x50] sm:$0xff]  ;;  %v2267_v53 = vld [vmem:[%s3373_s29 + $0x48] sm:$0xff]  ;;  %v2266_v39 = vld [vmem:[%s3373_s29 + $0x40] sm:$0xff] }
 0x2a0   : > { %v1872_v61 = vsel %vm1871_vm4, %v3275_v57, 0.0  ;;  %v1879_v62 = vmul.f32 %v3275_v57, %v3275_v57  ;;  %v1881_v1 = vadd.f32 %v1880_v60, %v1878_v59  ;;  %v2017_v59 = vld [vmem:[%s3215_s28 + $0x218] sm:$0xff]  ;;  %2162 = vmatprep.subr.mxu1 %v2019_v37  ;;  %v1988_v60 = vld [vmem:[%s3215_s28 + $0x130] sm:$0xff]  ;;  %2120 = vmatpush2.msra.mxu0 %v1990_v55 }
 0x2a1   : > { %v1873_v63 = vadd.f32 %v1872_v61, %v1870_v58  ;;  %v1989_v58 = vld [vmem:[%s3215_s28 + $0x138] sm:$0xff]  ;;  %v2016_v61 = vld [vmem:[%s3215_s28 + $0x210] sm:$0xff]  ;;  %2163 = vmatpush1.msra.mxu1 %v2018_v56  ;;  %v2050_v56 = vld [vmem:[%s824_s19] sm:$0x3] }
 0x2a2   : > { %v1882_v2 = vsel %vm1871_vm4, %v1879_v62, 0.0  ;;  %v1987_v62 = vld [vmem:[%s3215_s28 + $0x128] sm:$0xff]  ;;  %2121 = vmatprep.subr.mxu0 %v1989_v58  ;;  %2164 = vmatprep.subr.mxu1 %v2017_v59  ;;  %v2265_v37 = vld [vmem:[%s3373_s29 + $0x38] sm:$0xff]  ;;  %v2264_v55 = vld [vmem:[%s3373_s29 + $0x30] sm:$0xff]  ;;  %v2055_v58 = vrot.slane %v2050_v56, %v2957_v22  ;;  %v2059_v59 = vrot.slane %v2050_v56, %v2959_v25 }
 0x2a3   : > { %1874 = vadd.xlane.f32.xlu1 %v1873_v63  ;;  %v1883_v3 = vadd.f32 %v1882_v2, %v1881_v1  ;;  %v2015_v63 = vld [vmem:[%s3215_s28 + $0x208] sm:$0xff]  ;;  %v1986_v1 = vld [vmem:[%s3215_s28 + $0x120] sm:$0xff]  ;;  %2122 = vmatpush2.msra.mxu0 %v1988_v60 }
 0x2a4   : > { %v2014_v2 = vld [vmem:[%s3215_s28 + $0x200] sm:$0xff]  ;;  %2165 = vmatpush1.msra.mxu1 %v2016_v61  ;;  %2123 = vmatprep.subr.mxu0 %v1987_v62 }
 0x2a5   : > { %2166 = vmatprep.subr.mxu1 %v2015_v63  ;;  %2124 = vmatpush2.msra.mxu0 %v1986_v1 }
 0x2a6   : > { %2167 = vmatpush1.msra.mxu1 %v2014_v2 }
 0x2a7   : > { %1884 = vadd.xlane.f32.xlu1 %v1883_v3  ;;  %v1985_v3 = vld [vmem:[%s3215_s28 + $0x118] sm:$0xff]  ;;  %2196 = vmatprep.subr.mxu1 %v2049_v4 }
 0x2a8   : > { %2125 = vmatprep.subr.mxu0 %v1985_v3  ;;  %2197 = vmatpush2.msra.mxu1 %v2048_v6 }
 0x2a9   : > { %2126 = vmatpush2.msra.mxu0 %v1984_v5  ;;  %2198 = vmatprep.subr.mxu1 %v2047_v8 }
 0x2aa   : > { %2127 = vmatprep.subr.mxu0 %v1983_v7  ;;  %2199 = vmatpush2.msra.mxu1 %v2046_v10 }
 0x2ab   : > { %2128 = vmatpush2.msra.mxu0 %v1982_v9  ;;  %2293 = vmatprep.subr.mxu1 %v2741_v0 }
 0x32c   : > { %v1875_v11 = vpop.xlane.xlu1 %1874 }
 0x32d   : > { %v1886_v12 = vmul.f32 0.0025, %v1875_v11 }
 0x32f   : > { %v1888_v14 = vmul.f32 %v1886_v12, %v1886_v12  ;;  %v1890_v26 = vsub.f32 %v3265_v48, %v1886_v12  ;;  %v1892_v27 = vsub.f32 %v3269_v54, %v1886_v12  ;;  %v1893_v29 = vsub.f32 %v3275_v57, %v1886_v12 }
 0x330   : > { %v1885_v13 = vpop.xlane.xlu1 %1884  ;;  %v1891_v30 = vsub.f32 %v3263_v42, %v1886_v12 }
 0x331   : > { %v1887_v15 = vmul.f32 0.0025, %v1885_v13  ;;  %v2263_v13 = vld [vmem:[%s3373_s29 + $0x28] sm:$0xff] }
 0x333   : > { %v1889_v16 = vsub.f32 %v1887_v15, %v1888_v14  ;;  %v2262_v14 = vld [vmem:[%s3373_s29 + $0x20] sm:$0xff]  ;;  %v2261_v15 = vld [vmem:[%s3373_s29 + $0x18] sm:$0xff] }
 0x335   : > { %v1894_v17 = vadd.f32 1e-05, %v1889_v16  ;;  %v2260_v16 = vld [vmem:[%s3373_s29 + $0x10] sm:$0xff] }
 0x337   : > { %2713 = vrsqrt.f32 %v1894_v17  ;;  %v2259_v17 = vld [vmem:[%s3373_s29 + $0x8] sm:$0xff] }
 0x344   : > { %v2714_v38 = vpop.eup %2713 }
 0x345   : > { %v1897_v47 = vmul.f32 %v2714_v38, %v1891_v30  ;;  %v1899_v34 = vmul.f32 %v2714_v38, %v1893_v29  ;;  %v1896_v35 = vmul.f32 %v2714_v38, %v1890_v26  ;;  %v1898_v48 = vmul.f32 %v2714_v38, %v1892_v27  ;;  %v2277_v26 = vld [vmem:[%s3373_s29 + $0x98] sm:$0xff]  ;;  %v2276_v27 = vld [vmem:[%s3373_s29 + $0x90] sm:$0xff]  ;;  %v2275_v29 = vld [vmem:[%s3373_s29 + $0x88] sm:$0xff] }
 0x346   : > { %v2274_v30 = vld [vmem:[%s3373_s29 + $0x80] sm:$0xff] }
 0x347   : > { %v1922_v36 = vmul.f32 %v1908_v20, %v1897_v47  ;;  %v1924_v54 = vmul.f32 %v1916_v21, %v1899_v34  ;;  %v1921_v40 = vmul.f32 %v1904_v23, %v1896_v35  ;;  %v1923_v57 = vmul.f32 %v1912_v24, %v1898_v48  ;;  %v2281_v20 = vld [vmem:[%s3373_s29 + $0xb8] sm:$0xff]  ;;  %v2280_v21 = vld [vmem:[%s3373_s29 + $0xb0] sm:$0xff]  ;;  %v2279_v23 = vld [vmem:[%s3373_s29 + $0xa8] sm:$0xff] }
 0x348   : > { %v2278_v24 = vld [vmem:[%s3373_s29 + $0xa0] sm:$0xff] }
 0x349   : > { %v1947_v41 = vadd.f32 %v1933_v31, %v1922_v36  ;;  %v1949_v42 = vadd.f32 %v1941_v43, %v1924_v54  ;;  %v1946_v44 = vadd.f32 %v1929_v51, %v1921_v40  ;;  %v1948_v45 = vadd.f32 %v1937_v33, %v1923_v57  ;;  %v2207_v35 = vld [vmem:[%s828_s23] sm:$0x3] }
 0x34a   : > { %v2208_v48 = vld [vmem:[%s832_s1] sm:$0x3]  ;;  %v2240_v36 = vrot.slane %v2207_v35, %v2959_v25 }
 0x34b   : > { %2129 = vmatprep.mubr.f32.mxu0 %v1947_v41  ;;  %2674 = vmatprep.mubr.msk.f32.mxu1 %vm1871_vm4, %v1949_v42  ;;  %v2253_v42 = vrot.slane %v2208_v48, %v2959_v25 }
 0x34c   : > { %2130 = vmatmul.mubr.f32.vlgmr.msra.gmra.mxu0 %v1946_v44  ;;  %2201 = vmatmul.mubr.f32.vlgmr.msra.gmra.mxu1 %v1948_v45  ;;  %v2249_v45 = vrot.slane %v2208_v48, %v2957_v22 }
 0x34d   : > { %2294 = vmatpush1.msra.mxu1 %v2273_v28 }
 0x34e   : > { %2295 = vmatprep.subr.mxu1 %v2741_v0 }
 0x34f   : > { %2296 = vmatpush1.msra.mxu1 %v2272_v32 }
 0x350   : > { %2297 = vmatprep.subr.mxu1 %v2741_v0 }
 0x351   : > { %2298 = vmatpush1.msra.mxu1 %v2271_v46 }
 0x352   : > { %2299 = vmatprep.subr.mxu1 %v2741_v0 }
 0x353   : > { %2300 = vmatpush1.msra.mxu1 %v2270_v49 }
 0x354   : > { %2301 = vmatprep.subr.mxu1 %v2741_v0 }
 0x355   : > { %2302 = vmatpush1.msra.mxu1 %v2269_v50  ;;  %v2675_v50 = vld [vmem:[%s840_s30] ss:$0 sm:$0xff] }
 0x356   : > { %2303 = vmatprep.subr.mxu1 %v2741_v0 }
 0x357   : > { %2304 = vmatpush1.msra.mxu1 %v2268_v52 }
 0x358   : > { %2305 = vmatprep.subr.mxu1 %v2741_v0 }
 0x359   : > { %2306 = vmatpush1.msra.mxu1 %v2267_v53 }
 0x35a   : > { %2307 = vmatprep.subr.mxu1 %v2741_v0 }
 0x35b   : > { %2308 = vmatpush1.msra.mxu1 %v2266_v39 }
 0x35c   : > { %2309 = vmatprep.subr.mxu1 %v2741_v0 }
 0x35d   : > { %2310 = vmatpush1.msra.mxu1 %v2265_v37 }
 0x35e   : > { %2311 = vmatprep.subr.mxu1 %v2741_v0 }
 0x35f   : > { %2312 = vmatpush1.msra.mxu1 %v2264_v55 }
 0x360   : > { %2313 = vmatprep.subr.mxu1 %v2741_v0 }
 0x361   : > { %2314 = vmatpush1.msra.mxu1 %v2263_v13 }
 0x362   : > { %2315 = vmatprep.subr.mxu1 %v2741_v0 }
 0x363   : > { %2316 = vmatpush1.msra.mxu1 %v2262_v14 }
 0x364   : > { %2317 = vmatprep.subr.mxu1 %v2741_v0 }
 0x365   : > { %2318 = vmatpush1.msra.mxu1 %v2261_v15 }
 0x366   : > { %2319 = vmatprep.subr.mxu1 %v2741_v0 }
 0x367   : > { %2320 = vmatpush1.msra.mxu1 %v2260_v16 }
 0x368   : > { %2321 = vmatprep.subr.mxu1 %v2741_v0 }
 0x369   : > { %2322 = vmatpush1.msra.mxu1 %v2259_v17 }
 0x36a   : > { %2323 = vmatprep.subr.mxu1 %v2741_v0 }
 0x36b   : > { %2324 = vmatpush1.msra.mxu1 %v2258_v18 }
 0x36c   : > { %2339 = vmatprep.subr.mxu1 %v2741_v0 }
 0x36d   : > { %2340 = vmatpush2.msra.mxu1 %v2282_v19 }
 0x36e   : > { %2341 = vmatprep.subr.mxu1 %v2741_v0 }
 0x36f   : > { %2342 = vmatpush2.msra.mxu1 %v2281_v20 }
 0x370   : > { %2343 = vmatprep.subr.mxu1 %v2741_v0 }
 0x371   : > { %2344 = vmatpush2.msra.mxu1 %v2280_v21 }
 0x372   : > { %2345 = vmatprep.subr.mxu1 %v2741_v0 }
 0x373   : > { %2346 = vmatpush2.msra.mxu1 %v2279_v23 }
 0x374   : > { %2347 = vmatprep.subr.mxu1 %v2741_v0 }
 0x375   : > { %2348 = vmatpush2.msra.mxu1 %v2278_v24 }
 0x376   : > { %2349 = vmatprep.subr.mxu1 %v2741_v0 }
 0x377   : > { %2350 = vmatpush2.msra.mxu1 %v2277_v26 }
 0x378   : > { %2351 = vmatprep.subr.mxu1 %v2741_v0 }
 0x379   : > { %2352 = vmatpush2.msra.mxu1 %v2276_v27 }
 0x37a   : > { %2353 = vmatprep.subr.mxu1 %v2741_v0 }
 0x37b   : > { %2354 = vmatpush2.msra.mxu1 %v2275_v29 }
 0x37c   : > { %2355 = vmatprep.subr.mxu1 %v2741_v0  ;;  %v2236_v0 = vrot.slane %v2207_v35, %v2957_v22 }
 0x37d   : > { %2356 = vmatpush2.msra.mxu1 %v2274_v30 }
 0x40c   : > { %v2131_v60 = vpop.f32.mrf.mxu0  ;;  %v2202_v61 = vpop.f32.mrf.mxu1 }
 0x40d   : > { %v2132_v62 = vadd.f32 %v2131_v60, %v2055_v58 }
 0x40e   : > { %v2133_v63 = vpop.f32.mrf.mxu0  ;;  %v2204_v3 = vpop.f32.mrf.mxu1 }
 0x40f   : > { %v2203_v1 = vadd.f32 %v2202_v61, %v2132_v62  ;;  %v2134_v2 = vadd.f32 %v2133_v63, %v2059_v59 }
 0x411   : > { %v2205_v4 = vadd.f32 %v2204_v3, %v2134_v2  ;;  %v3404_v5 = vmax.f32 %v2203_v1, 0.0 }
 0x413   : > { %v3406_v6 = vmax.f32 %v2205_v4, 0.0  ;;  %v2216_v10 = vmul.f32 %v3404_v5, %v3404_v5 }
 0x415   : > { %v2212_v7 = vsel %vm2211_vm5, %v3406_v6, 0.0  ;;  %v2217_v8 = vmul.f32 %v3406_v6, %v3406_v6 }
 0x416   : > { %v2213_v9 = vadd.f32 %v2212_v7, %v3404_v5 }
 0x417   : > { %v2218_v11 = vsel %vm2211_vm5, %v2217_v8, 0.0 }
 0x418   : > { %2214 = vadd.xlane.f32.xlu0 %v2213_v9  ;;  %v2219_v12 = vadd.f32 %v2218_v11, %v2216_v10 }
 0x41a   : > { %2220 = vadd.xlane.f32.xlu1 %v2219_v12 }
 0x4a1   : > { %v2215_v38 = vpop.xlane.xlu0 %2214 }
 0x4a2   : > { %v2222_v31 = vmul.f32 0.005, %v2215_v38 }
 0x4a3   : > { %v2221_v43 = vpop.xlane.xlu1 %2220 }
 0x4a4   : > { %v2223_v51 = vmul.f32 0.005, %v2221_v43  ;;  %v2224_v33 = vmul.f32 %v2222_v31, %v2222_v31  ;;  %v2226_v54 = vsub.f32 %v3404_v5, %v2222_v31  ;;  %v2227_v40 = vsub.f32 %v3406_v6, %v2222_v31 }
 0x4a6   : > { %v2225_v47 = vsub.f32 %v2223_v51, %v2224_v33 }
 0x4a8   : > { %v2228_v34 = vadd.f32 1e-05, %v2225_v47 }
 0x4aa   : > { %2715 = vrsqrt.f32 %v2228_v34 }
 0x4b7   : > { %v2716_v57 = vpop.eup %2715 }
 0x4b8   : > { %v2231_v41 = vmul.f32 %v2716_v57, %v2227_v40  ;;  %v2230_v44 = vmul.f32 %v2716_v57, %v2226_v54 }
 0x4ba   : > { %v2244_v28 = vmul.f32 %v2240_v36, %v2231_v41  ;;  %v2243_v32 = vmul.f32 %v2236_v0, %v2230_v44 }
 0x4bc   : > { %v2257_v46 = vadd.f32 %v2253_v42, %v2244_v28  ;;  %v2256_v49 = vadd.f32 %v2249_v45, %v2243_v32 }
 0x4be   : > { %2676 = vmatprep.mubr.msk.f32.mxu1 %vm2211_vm5, %v2257_v46 }
 0x4bf   : > { %2358 = vmatmul.mubr.f32.vlgmr.msra.gmra.mxu1 %v2256_v49 }
 0x57f   : > { %v2359_v25 = vpop.f32.mrf.mxu1 }
 0x580   : > { %v2360_v22 = vadd.f32 %v2675_v50, %v2359_v25 }
 0x581   : > { %v2361_v52 = vpop.f32.mrf.mxu1 }
 0x582   : > { %2364 = vst.msk [vmem:[%s847_s22] sm:$0xff] %vm2363_vm6, %v2360_v22 }
 0x583 PF: > { %s27_s26 = sadd.s32 1, %s2739_s26   ;;  %s3499_s24 = smov %s2735_s25 }
 0x584   : > { %p24_p5 = scmp.ge.s32.totalorder %s27_s26, 4   ;;  %s3500_s25 = smov %s3502_s27 }
 0x586   :  { %26 = sbr.rel (!%p24_p5) target bundleno = 3 (0x3), region = 166 }

</bundles_post_ra>
